<compile_context>
chip_gen: v7x
topology: tpu7x:2x2x1
jax: 0.10.0
libtpu: 0.0.40
codegen_flags: <defaults>
</compile_context>

<pallas_src>
import functools

import jax
import jax.numpy as jnp
from jax.experimental import pallas as pl
from jax.experimental.pallas import tpu as pltpu


def _lane_partial_sum(x, lanes):
    """Sum a (rows, cols) f32 array down to (rows, lanes) lane-wide partials.

    cols is a static multiple of `lanes`; the static 128-lane slices are free
    vreg selects, so this avoids a full cross-lane reduce and a masked 1-lane
    store on every grid step (final reduce happens once at t == last).
    """
    rows, cols = x.shape
    if lanes == 1:
        return jnp.sum(x, axis=1, keepdims=True)
    assert cols % lanes == 0
    acc = x[:, 0:lanes]
    for j in range(1, cols // lanes):
        acc = acc + x[:, j * lanes:(j + 1) * lanes]
    return acc


def _ce_score_kernel(logits_ref, labels_ref, out_ref, loss_ref, cnt_ref, *,
                     block_b, acc_lanes):
    """One (block_b, block_t, V) tile of the masked cross-entropy score.

    logits_ref: (block_b, block_t, V) VMEM block, native dtype (bf16 / f32)
    labels_ref: (B, block_t)          int32 VMEM block (full batch, tiny)
    out_ref   : (block_b, 1, 1)       f32 VMEM block (resident across T axis)
    loss_ref  : (block_b, acc_lanes)  f32 scratch — lane-wide loss partials
    cnt_ref   : (block_b, acc_lanes)  f32 scratch — lane-wide count partials
    """
    b = pl.program_id(0)
    t = pl.program_id(1)

    @pl.when(t == 0)
    def _():
        loss_ref[...] = jnp.zeros_like(loss_ref)
        cnt_ref[...] = jnp.zeros_like(cnt_ref)

    logits = logits_ref[...]                               # (Bb, Tt, V) native
    row0 = pl.multiple_of(b * block_b, block_b)
    labels = labels_ref[pl.ds(row0, block_b), :]           # (Bb, Tt) int32

    # Numerically-stable logsumexp on SHIFTED values computed in the input
    # dtype; only the exp input / accumulation are widened to f32 (no f32 copy
    # of the whole tile is materialized).
    m = jnp.max(logits, axis=-1, keepdims=True)            # (Bb, Tt, 1) native
    shifted = logits - m                                   # (Bb, Tt, V) native
    sum_exp = jnp.sum(jnp.exp(shifted.astype(jnp.float32)), axis=-1)  # (Bb, Tt)
    log_z_shifted = jnp.log(sum_exp)                       # (Bb, Tt) f32

    # Label gather on the shifted values via a one-hot compare on a lane iota
    # (vocab lives on lanes). The sum has exactly one non-zero per row, so it
    # is exact even in bf16; widen only after the reduce.
    vocab_iota = jax.lax.broadcasted_iota(jnp.int32, logits.shape, 2)
    onehot = vocab_iota == labels[:, :, None]              # (Bb, Tt, V)
    label_shift = jnp.sum(jnp.where(onehot, shifted, jnp.zeros_like(shifted)),
                          axis=-1).astype(jnp.float32)     # (Bb, Tt) f32

    # ignore_index=0: zero loss / zero count for pad tokens.
    valid = labels != 0
    tok_loss = jnp.where(valid, log_z_shifted - label_shift, 0.0)  # (Bb, Tt)
    tok_cnt = valid.astype(jnp.float32)                             # (Bb, Tt)

    loss_ref[...] += _lane_partial_sum(tok_loss, acc_lanes)
    cnt_ref[...] += _lane_partial_sum(tok_cnt, acc_lanes)

    @pl.when(t == pl.num_programs(1) - 1)
    def _():
        total = jnp.sum(loss_ref[...], axis=1, keepdims=True)       # (Bb, 1)
        n = jnp.sum(cnt_ref[...], axis=1, keepdims=True)            # (Bb, 1)
        # Guard all-pad rows (torch would NaN here); return 0.0 instead.
        score = jnp.where(n > 0.0, total / jnp.maximum(n, 1.0), 0.0)
        out_ref[...] = score[:, :, None]                             # (Bb, 1, 1)


def _tpu_vmem_capacity_bytes():
    try:
        info = pltpu.get_tpu_info()
        cap = getattr(info, "vmem_capacity_bytes", None)
        if cap:
            return int(cap)
    except Exception:
        pass
    return 64 * 1024 * 1024  # conservative default (== v7x physical VMEM)


def _vmem_budget():
    """Per-generation (per-DMA-buffer soft budget, scoped vmem_limit_bytes)."""
    cap = _tpu_vmem_capacity_bytes()
    if cap >= 120 * 1024 * 1024:
        # v5e / v6e (128 MiB physical VMEM): large streaming tiles.
        per_buf, limit = 14 * 1024 * 1024, 100 * 1024 * 1024
    else:
        # v7x (64 MiB physical) or unknown: leave headroom for 2x double-
        # buffered logits plus the shifted/exp temporaries (~4-6x tile bytes).
        per_buf, limit = 5 * 1024 * 1024, 40 * 1024 * 1024
    return per_buf, min(limit, int(cap * 0.8))


def _pick_block_b(B):
    if B <= 1:
        return 1
    # Guarantee >= 2 blocks along the parallel B axis so both TensorCores
    # engage on v7x; cap at 8 rows per block.
    for cand in (8, 4, 2, 1):
        if cand <= B // 2 and B % cand == 0:
            return cand
    return 1


def _pick_block_t(block_b, T, V, dtype, budget_bytes):
    itemsize = jnp.dtype(dtype).itemsize
    row_bytes = block_b * V * itemsize
    # T tiles are multiples of 128: keeps the labels block legal under the
    # (8,128) rule, satisfies sublane packing for every dtype (f32:8 / bf16:16
    # / int8:32 rows per vreg) and keeps DMA granularity large.
    for cand in (2048, 1024, 512, 256, 128):
        if cand <= T and T % cand == 0 and cand * row_bytes <= budget_bytes:
            return cand
    if T * row_bytes <= budget_bytes:
        return T  # small T: single full-T tile (always a legal block)
    # TODO(synk): tile V with an online logsumexp for very large vocabularies;
    # until then take the smallest 128-row tile and rely on vmem_limit_bytes.
    if T >= 128 and T % 128 == 0:
        return 128
    return T


def generated_inchi_scorer(logits, next_token_ids, *, block_b=None, block_t=None):
    """Pallas-backed equivalent of GeneratedInChIScorer.forward.

    Returns a (B,) float32 array of per-sequence mean cross-entropy over
    non-pad tokens (ignore_index=0). The original module calls .tolist();
    the caller can do `list(result)` / `result.tolist()` on host.
    """
    B, T, V = logits.shape
    labels = next_token_ids.astype(jnp.int32)
    itemsize = jnp.dtype(logits.dtype).itemsize

    budget, vmem_limit = _vmem_budget()
    if block_b is None:
        block_b = _pick_block_b(B)
    block_b = min(block_b, B)
    if block_t is None:
        block_t = _pick_block_t(block_b, T, V, logits.dtype, budget)
        # Very large V: shrink block_b before overshooting the soft budget.
        while block_b > 1 and block_b * block_t * V * itemsize > budget:
            block_b = max(d for d in (1, 2, 4) if d < block_b and B % d == 0)
            block_t = _pick_block_t(block_b, T, V, logits.dtype, budget)
    block_t = min(block_t, T)

    assert B % block_b == 0, "block_b must divide B"
    assert T % block_t == 0, "block_t must divide T"
    assert block_t == T or block_t % 128 == 0, \
        "block_t must be a multiple of 128 or the full T"

    acc_lanes = 128 if block_t % 128 == 0 else 1
    grid = (B // block_b, T // block_t)

    kernel = functools.partial(_ce_score_kernel, block_b=block_b,
                               acc_lanes=acc_lanes)

    out = pl.pallas_call(
        kernel,
        out_shape=jax.ShapeDtypeStruct((B, 1, 1), jnp.float32),
        grid_spec=pltpu.PrefetchScalarGridSpec(
            num_scalar_prefetch=0,
            grid=grid,
            in_specs=[
                # Logits streamed in their native dtype (bf16 on real models).
                pl.BlockSpec((block_b, block_t, V), lambda b, t: (b, t, 0)),
                # Labels: full-B block (a few KB per step); the block_b rows
                # are sliced on the sublane axis inside the kernel, keeping
                # this BlockSpec legal for any block_b (including block_b=1).
                pl.BlockSpec((B, block_t), lambda b, t: (0, t)),
            ],
            # Same output block across the T axis -> resident accumulator slot.
            out_specs=pl.BlockSpec((block_b, 1, 1), lambda b, t: (b, 0, 0)),
            scratch_shapes=[
                pltpu.VMEM((block_b, acc_lanes), jnp.float32),  # loss partials
                pltpu.VMEM((block_b, acc_lanes), jnp.float32),  # count partials
            ],
        ),
        compiler_params=pltpu.CompilerParams(
            # B blocks are independent (megacore-shardable); T is the reduction.
            dimension_semantics=("parallel", "arbitrary"),
            vmem_limit_bytes=vmem_limit,
        ),
    )(logits, labels)
    return out[:, 0, 0]


def _reference(logits, labels):
    """Pure-JAX reference mirroring torch CrossEntropyLoss(ignore_index=0)."""
    logits = logits.astype(jnp.float32)
    logz = jax.scipy.special.logsumexp(logits, axis=-1)               # (B, T)
    label_logit = jnp.take_along_axis(
        logits, labels[..., None].astype(jnp.int32), axis=-1)[..., 0]
    valid = labels != 0
    tok = jnp.where(valid, logz - label_logit, 0.0)
    return tok.sum(axis=1) / valid.sum(axis=1).astype(jnp.float32)


if __name__ == "__main__":
    key = jax.random.PRNGKey(0)
    k_logits, k_labels = jax.random.split(key)

    B, T, V = 2, 256, 512  # small synthetic shapes: batch, seq, vocab
    logits_f32 = jax.random.normal(k_logits, (B, T, V), dtype=jnp.float32)
    labels = jax.random.randint(k_labels, (B, T), 0, V, dtype=jnp.int32)
    # Guarantee at least one valid token and some pad (ignore_index=0) tokens.
    labels = labels.at[:, 0].set(jnp.maximum(labels[:, 0], 1))
    labels = labels.at[:, -16:].set(0)

    want = _reference(logits_f32, labels)

    # 1) f32, explicit T tiling (grid (2, 2): exercises the resident
    #    accumulator and the lane-wide partial sums).
    got = jax.block_until_ready(
        generated_inchi_scorer(logits_f32, labels, block_t=128))
    if not jnp.allclose(got, want, rtol=1e-4, atol=1e-4):
        raise AssertionError(f"f32 tiled mismatch: {got} vs {want}")

    # 2) Auto tiling (block_b=1 -> 2 parallel B blocks, single full-T tile).
    got_auto = jax.block_until_ready(generated_inchi_scorer(logits_f32, labels))
    if not jnp.allclose(got_auto, want, rtol=1e-4, atol=1e-4):
        raise AssertionError(f"f32 auto mismatch: {got_auto} vs {want}")

    # 3) Multi-row B block (block_b == B) with T tiling.
    got_bb = jax.block_until_ready(
        generated_inchi_scorer(logits_f32, labels, block_b=2, block_t=128))
    if not jnp.allclose(got_bb, want, rtol=1e-4, atol=1e-4):
        raise AssertionError(f"f32 block_b=2 mismatch: {got_bb} vs {want}")

    # 4) bf16 logits streamed natively; max/shift/label-gather stay in bf16
    #    in-kernel, exp/accumulation in f32 (looser tolerance for the bf16
    #    rounding of the shifted logits).
    logits_bf16 = logits_f32.astype(jnp.bfloat16)
    want_bf16 = _reference(logits_bf16, labels)
    got_bf16 = jax.block_until_ready(
        generated_inchi_scorer(logits_bf16, labels, block_t=128))
    if not jnp.allclose(got_bf16, want_bf16, rtol=1e-2, atol=1e-2):
        raise AssertionError(f"bf16 mismatch: {got_bf16} vs {want_bf16}")

    # torch returns cross_entropy.tolist(); equivalent python list on host:
    _ = [float(v) for v in got]

    print("KERNEL_OK")
</pallas_src>

<mosaic_0001>
module attributes {stable_mosaic.version = 11 : i64} {
  func.func @_ce_score_kernel(%arg0: i32, %arg1: i32, %arg2: memref<1x128x512xf32, #tpu.memory_space<vmem>>, %arg3: memref<2x128xi32, #tpu.memory_space<vmem>>, %arg4: memref<1x1x1xf32, #tpu.memory_space<vmem>>, %arg5: memref<1x128xf32, #tpu.memory_space<vmem>>, %arg6: memref<1x128xf32, #tpu.memory_space<vmem>>) attributes {dimension_semantics = [#tpu.dimension_semantics<parallel>, #tpu.dimension_semantics<arbitrary>], iteration_bounds = array<i64: 2, 2>, scalar_prefetch = 0 : i64, scratch_operands = 2 : i64, tpu.core_type = #tpu.core_type<tc>, window_params = [{transform_indices = @transform_0, window_bounds = array<i64: 1, 128, 512>}, {transform_indices = @transform_1, window_bounds = array<i64: 2, 128>}, {transform_indices = @transform_2, window_bounds = array<i64: 1, 1, 1>}]} {
    %c0_i32 = arith.constant 0 : i32
    %0 = arith.cmpi eq, %arg1, %c0_i32 : i32
    %1 = arith.extui %0 : i1 to i32
    %c0_i32_0 = arith.constant 0 : i32
    %2 = arith.cmpi ne, %1, %c0_i32_0 : i32
    scf.if %2 {
      %cst_19 = arith.constant 0.000000e+00 : f32
      %38 = vector.broadcast %cst_19 : f32 to vector<1x128xf32>
      %c0_20 = arith.constant 0 : index
      %c0_21 = arith.constant 0 : index
      %39 = vector.load %arg5[%c0_20, %c0_21] : memref<1x128xf32, #tpu.memory_space<vmem>>, vector<1x128xf32>
      tpu.vector_store %arg5[%c0_20, %c0_21], %38 {strides = array<i32>} : memref<1x128xf32, #tpu.memory_space<vmem>>, vector<1x128xf32>,
      %cst_22 = arith.constant 0.000000e+00 : f32
      %40 = vector.broadcast %cst_22 : f32 to vector<1x128xf32>
      %c0_23 = arith.constant 0 : index
      %c0_24 = arith.constant 0 : index
      %41 = vector.load %arg6[%c0_23, %c0_24] : memref<1x128xf32, #tpu.memory_space<vmem>>, vector<1x128xf32>
      tpu.vector_store %arg6[%c0_23, %c0_24], %40 {strides = array<i32>} : memref<1x128xf32, #tpu.memory_space<vmem>>, vector<1x128xf32>,
    } else {
    }
    %c0 = arith.constant 0 : index
    %c0_1 = arith.constant 0 : index
    %c0_2 = arith.constant 0 : index
    %3 = vector.load %arg2[%c0, %c0_1, %c0_2] : memref<1x128x512xf32, #tpu.memory_space<vmem>>, vector<1x128x512xf32>
    %c1_i32 = arith.constant 1 : i32
    %4 = arith.muli %arg0, %c1_i32 : i32
    %5 = tpu.assume_multiple %4, 1 : i32
    %6 = arith.index_cast %5 : i32 to index
    %c0_3 = arith.constant 0 : index
    %7 = vector.load %arg3[%6, %c0_3] : memref<2x128xi32, #tpu.memory_space<vmem>>, vector<1x128xi32>
    %cst = arith.constant dense<0xFF800000> : vector<1x128xf32>
    %8 = vector.multi_reduction <maximumf>, %3, %cst [2] : vector<1x128x512xf32> to vector<1x128xf32>
    %9 = vector.shape_cast %8 : vector<1x128xf32> to vector<1x128x1xf32>
    %10 = vector.broadcast %9 : vector<1x128x1xf32> to vector<1x128x512xf32>
    %11 = arith.subf %3, %10 : vector<1x128x512xf32>
    %12 = math.exp %11 : vector<1x128x512xf32>
    %cst_4 = arith.constant dense<0.000000e+00> : vector<1x128xf32>
    %13 = vector.multi_reduction <add>, %12, %cst_4 [2] : vector<1x128x512xf32> to vector<1x128xf32>
    %14 = math.log %13 : vector<1x128xf32>
    %15 = tpu.iota {dimensions = array<i32: 2>} : vector<1x128x512xi32>
    %16 = vector.shape_cast %7 : vector<1x128xi32> to vector<1x128x1xi32>
    %17 = vector.broadcast %16 : vector<1x128x1xi32> to vector<1x128x512xi32>
    %18 = arith.cmpi eq, %15, %17 : vector<1x128x512xi32>
    %cst_5 = arith.constant 0.000000e+00 : f32
    %19 = vector.broadcast %cst_5 : f32 to vector<1x128x512xf32>
    %20 = arith.select %18, %11, %19 : vector<1x128x512xi1>, vector<1x128x512xf32>
    %cst_6 = arith.constant dense<0.000000e+00> : vector<1x128xf32>
    %21 = vector.multi_reduction <add>, %20, %cst_6 [2] : vector<1x128x512xf32> to vector<1x128xf32>
    %c0_i32_7 = arith.constant 0 : i32
    %22 = vector.broadcast %c0_i32_7 : i32 to vector<1x128xi32>
    %23 = arith.cmpi ne, %7, %22 : vector<1x128xi32>
    %24 = arith.subf %14, %21 : vector<1x128xf32>
    %cst_8 = arith.constant 0.000000e+00 : f32
    %25 = vector.broadcast %cst_8 : f32 to vector<1x128xf32>
    %26 = arith.select %23, %24, %25 : vector<1x128xi1>, vector<1x128xf32>
    %27 = arith.extui %23 : vector<1x128xi1> to vector<1x128xi32>
    %28 = arith.sitofp %27 : vector<1x128xi32> to vector<1x128xf32>
    %c0_9 = arith.constant 0 : index
    %c0_10 = arith.constant 0 : index
    %29 = vector.load %arg5[%c0_9, %c0_10] : memref<1x128xf32, #tpu.memory_space<vmem>>, vector<1x128xf32>
    %30 = arith.addf %29, %26 : vector<1x128xf32>
    %c0_11 = arith.constant 0 : index
    %c0_12 = arith.constant 0 : index
    %31 = vector.load %arg5[%c0_11, %c0_12] : memref<1x128xf32, #tpu.memory_space<vmem>>, vector<1x128xf32>
    tpu.vector_store %arg5[%c0_11, %c0_12], %30 {strides = array<i32>} : memref<1x128xf32, #tpu.memory_space<vmem>>, vector<1x128xf32>,
    %c0_13 = arith.constant 0 : index
    %c0_14 = arith.constant 0 : index
    %32 = vector.load %arg6[%c0_13, %c0_14] : memref<1x128xf32, #tpu.memory_space<vmem>>, vector<1x128xf32>
    %33 = arith.addf %32, %28 : vector<1x128xf32>
    %c0_15 = arith.constant 0 : index
    %c0_16 = arith.constant 0 : index
    %34 = vector.load %arg6[%c0_15, %c0_16] : memref<1x128xf32, #tpu.memory_space<vmem>>, vector<1x128xf32>
    tpu.vector_store %arg6[%c0_15, %c0_16], %33 {strides = array<i32>} : memref<1x128xf32, #tpu.memory_space<vmem>>, vector<1x128xf32>,
    %c1_i32_17 = arith.constant 1 : i32
    %35 = arith.cmpi eq, %arg1, %c1_i32_17 : i32
    %36 = arith.extui %35 : i1 to i32
    %c0_i32_18 = arith.constant 0 : i32
    %37 = arith.cmpi ne, %36, %c0_i32_18 : i32
    scf.if %37 {
      %c0_19 = arith.constant 0 : index
      %c0_20 = arith.constant 0 : index
      %38 = vector.load %arg5[%c0_19, %c0_20] : memref<1x128xf32, #tpu.memory_space<vmem>>, vector<1x128xf32>
      %cst_21 = arith.constant dense<0.000000e+00> : vector<1xf32>
      %39 = vector.multi_reduction <add>, %38, %cst_21 [1] : vector<1x128xf32> to vector<1xf32>
      %40 = vector.shape_cast %39 : vector<1xf32> to vector<1x1xf32>
      %c0_22 = arith.constant 0 : index
      %c0_23 = arith.constant 0 : index
      %41 = vector.load %arg6[%c0_22, %c0_23] : memref<1x128xf32, #tpu.memory_space<vmem>>, vector<1x128xf32>
      %cst_24 = arith.constant dense<0.000000e+00> : vector<1xf32>
      %42 = vector.multi_reduction <add>, %41, %cst_24 [1] : vector<1x128xf32> to vector<1xf32>
      %43 = vector.shape_cast %42 : vector<1xf32> to vector<1x1xf32>
      %cst_25 = arith.constant 0.000000e+00 : f32
      %44 = vector.broadcast %cst_25 : f32 to vector<1x1xf32>
      %45 = arith.cmpf ogt, %43, %44 : vector<1x1xf32>
      %cst_26 = arith.constant 1.000000e+00 : f32
      %46 = vector.broadcast %cst_26 : f32 to vector<1x1xf32>
      %47 = arith.maximumf %43, %46 : vector<1x1xf32>
      %48 = arith.divf %40, %47 : vector<1x1xf32>
      %cst_27 = arith.constant 0.000000e+00 : f32
      %49 = vector.broadcast %cst_27 : f32 to vector<1x1xf32>
      %50 = arith.select %45, %48, %49 : vector<1x1xi1>, vector<1x1xf32>
      %51 = vector.shape_cast %50 : vector<1x1xf32> to vector<1x1x1xf32>
      %c0_28 = arith.constant 0 : index
      %c0_29 = arith.constant 0 : index
      %c0_30 = arith.constant 0 : index
      %52 = vector.load %arg4[%c0_28, %c0_29, %c0_30] : memref<1x1x1xf32, #tpu.memory_space<vmem>>, vector<1x1x1xf32>
      tpu.vector_store %arg4[%c0_28, %c0_29, %c0_30], %51 {strides = array<i32>} : memref<1x1x1xf32, #tpu.memory_space<vmem>>, vector<1x1x1xf32>,
    } else {
    }
    return
  }
  func.func @transform_0(%arg0: i32, %arg1: i32) -> (i32, i32, i32) {
    %c0_i32 = arith.constant 0 : i32
    %c0_i32_0 = arith.constant 0 : i32
    return %arg0, %arg1, %c0_i32 : i32, i32, i32
  }
  func.func @transform_1(%arg0: i32, %arg1: i32) -> (i32, i32) {
    %c0_i32 = arith.constant 0 : i32
    %c0_i32_0 = arith.constant 0 : i32
    return %c0_i32, %arg1 : i32, i32
  }
  func.func @transform_2(%arg0: i32, %arg1: i32) -> (i32, i32, i32) {
    %c0_i32 = arith.constant 0 : i32
    %c0_i32_0 = arith.constant 0 : i32
    %c0_i32_1 = arith.constant 0 : i32
    return %arg0, %c0_i32, %c0_i32_0 : i32, i32, i32
  }
}

</mosaic_0001>

<bundles_post_ra>
// kernel: tpu_custom_call.1
= control target key start
LH: loop header
LB: loop body
LE: loop exit
PB: predicated region body
PF: predicated region fallthrough
CT: control target
= control target key end

     0   :  { %7 = vsyncpa [#allocation5], 0  ;;  %s3133_s0 = inlined_call_operand.hbm [shape: f32[2,256,512], index: 0, kind: input, shape index: {}]   ;;  %s3134_s1 = inlined_call_operand.hbm [shape: s32[2,256], index: 1, kind: input, shape index: {}]   ;;  %s3135_s2 = inlined_call_operand.vmem [shape: f32[2,1,1], index: 2, kind: output, shape index: {}]  }
   0x1   :  { %9 = vsyncpa [#allocation5 + $0x1], 0 }
   0x2   :  { %10 = vsyncpa [#allocation7], 0 }
   0x3   :  { %12 = vsyncpa [#allocation7 + $0x1], 0  ;;  %s1685_s9 = smov 0   ;;  %s1687_s10 = smov 0  }
   0x4   :  { %s1689_s11 = smov 0   ;;  %s1691_s12 = smov 0  }
   0x5   :  { %s1693_s13 = smov 0   ;;  %s1695_s14 = smov 0  }
   0x6   :  { %s1697_s15 = smov 0   ;;  %s1699_s16 = smov 0  }
   0x7   :  { %s1701_s17 = smov 0   ;;  %s1703_s18 = smov 0  }
   0x8   :  { %s1705_s19 = smov 0  }
   0x9 LB: > { %s27_s20 = sadd.s32 1, %s1654_s17  ;;  %s30_s21 = sadd.s32 1, %s1658_s18  ;;  %s1662_s19 = sphi %s1705_s19, %s18_s19   ;;  %s1658_s18 = sphi %s1703_s18, %s3386_s18   ;;  %s1654_s17 = sphi %s1701_s17, %s3385_s17   ;;  %s1650_s16 = sphi %s1699_s16, %s3384_s16   ;;  %s1646_s15 = sphi %s1697_s15, %s3383_s15   ;;  %s1642_s14 = sphi %s1695_s14, %s3382_s14   ;;  %s1638_s13 = sphi %s1693_s13, %s3381_s13   ;;  %s1634_s12 = sphi %s1691_s12, %s3380_s12   ;;  %s1630_s11 = sphi %s1689_s11, %s3379_s11   ;;  %s1626_s10 = sphi %s1687_s10, %s3378_s10   ;;  %s1622_s9 = sphi %s1685_s9, %s3377_s9  }
   0xa   : > { %p28_p0 = scmp.ge.s32.totalorder %s27_s20, 2  ;;  %s39_s22 = sadd.s32 1, %s1642_s14 }
   0xb   : > { %p46_p1 = scmp.ne.s32.totalorder %s1642_s14, %s1638_s13  ;;  %p3139_p2 = scmp.eq.s32.totalorder %s1662_s19, 0 }
   0xc   : > { %s3388_s20 = smov (%p28_p0, %s27_s20), 0  ;;  %s3390_s21 = smov (!%p28_p0, %s30_s21), %s1658_s18 }
   0xd   : > { %3203 = sst [smem:[#allocation10_spill]] %s3388_s20  ;;  %s1751_s23 = ssub.s32 %s1654_s17, %s3388_s20 }
   0xe   : > { %p1755_p3 = por %p3139_p2, %p46_p1  ;;  %p32_p4 = scmp.ge.s32.totalorder %s3390_s21, 2 }
   0xf   : > { %p52_p5 = scmp.ne.s32.totalorder %s1638_s13, %s1634_s12  ;;  %p3138_p6 = scmp.lt.s32.totalorder %s1662_s19, 4 }
  0x10   : > { %s3392_s21 = smov (%p32_p4, %s3390_s21), 0  ;;  %s128_s25 = sand.u32 1, %s1642_s14  }
  0x11   : > { %3205 = sst [smem:[#allocation11_spill]] %s3392_s21  ;;  %s1239_s26 = sshll.u32 %s1654_s17, 6 }
  0x12   : > { %s34_s27 = ssub.s32 %s1658_s18, %s3392_s21  ;;  %s1224_s29 = sshll.u32 %s128_s25, 9 }
  0x13   : > { %s36_s28 = sor.u32 %s1751_s23, %s34_s27  ;;  %s1227_s30 = sshll.u32 %s1658_s18, 7 }
  0x14   : > { %p37_p7 = scmp.eq.s32.totalorder %s36_s28, 0  ;;  %s132_s3 = scalar_lea.vmem [#allocation4], %s1224_s29 }
  0x15   : > { %s142_s4 = sshll.u32 %s132_s3, 4  ;;  %s139_s6 = sadd.s32 %s1239_s26, %s1227_s30  ;;  %s1773_s4 = int_to_ptr.vmem [resolvable:$true] %s142_s4 }
  0x16   : > { %s1771_s5 = scalar_select %p37_p7, %s1642_s14, %s39_s22  }
  0x17   : > { %s1228_s7 = sshll.u32 %s139_s6, 7  ;;  %p1779_p8 = pnand %p3138_p6, %p1755_p3 }
  0x18   : > { %s1786_s27 = scalar_lea.hbm %s3133_s0, %s1228_s7  ;;  %s1788_s22 = scalar_lea.sflag [#allocation5], %s128_s25 }
  0x19   : > { %s1508_s26 = scalar_lea.hbm %s1786_s27, 8192  ;;  %p1510_p10 = pneg %p1779_p8 }
  0x1a   : > { %p1509_p9 = scmp.ne.s32.totalorder %s1786_s27, %s1508_s26  ;;  %s1513_s21 = scalar_lea.hbm %s3133_s0, 32768 }
  0x1b   : > { %p1514_p13 = scmp.lt.u32.totalorder %s1786_s27, %s3133_s0  ;;  %p1515_p0 = scmp.lt.u32.totalorder %s1513_s21, %s1508_s26 }
  0x1c   : > { %p1511_p11 = pnand %p1510_p10, %p1509_p9  ;;  %p1517_p3 = scmp.lt.u32.totalorder %s1508_s26, %s1786_s27 }
  0x1d   : > { %p1516_p1 = por %p1515_p0, %p1514_p13 }
  0x1e   : > { %p1512_p12 = pneg %p1511_p11 }
  0x1f   : > { %p1518_p4 = por %p1517_p3, %p1516_p1 }
  0x21   : > { %p1519_p7 = pnand %p1518_p4, %p1512_p12 }
  0x23   : > { %1522 = shalt.err (!%p1519_p7)
}
  0x24   : > { %s1523_s25 = scalar_lea.vmem %s1773_s4, 8192  ;;  %s1664_s30 = smov [#allocation4]  }
  0x25   : > { %p1524_p9 = scmp.ne.s32.totalorder %s1773_s4, %s1523_s25  ;;  %s1528_s3 = sshll.u32 %s1664_s30, 4  ;;  %s1529_s3 = int_to_ptr.vmem [resolvable:$false] %s1528_s3 }
  0x26   : > { %s1530_s6 = scalar_lea.vmem %s1529_s3, 16384  ;;  %p1531_p2 = scmp.lt.s32.totalorder %s1773_s4, %s1529_s3 }
  0x27   : > { %p1526_p11 = pnand %p1524_p9, %p1510_p10  ;;  %p1532_p13 = scmp.lt.s32.totalorder %s1530_s6, %s1523_s25 }
  0x29   : > { %p1527_p6 = pneg %p1526_p11  ;;  %p1533_p0 = por %p1532_p13, %p1531_p2 }
  0x2b   : > { %p1534_p1 = pnand %p1533_p0, %p1527_p6 }
  0x2d   : > { %1537 = shalt.err (!%p1534_p1)
}
  0x2e   : > { %s1665_s7 = smov 512   ;;  %s1666_s26 = smov 32  }
  0x2f   : > { %1247 = dma.hbm_to_vmem [thread:$0]  (!%p1779_p8), %s1786_s27, 8192, %s1773_s4, %s1788_s22, %s1665_s7, %s1665_s7, %s1666_s26  }
  0x30   : > { %p1231_p2 = scmp.ge.s32.totalorder %s1662_s19, 1  ;;  %p168_p6 = scmp.lt.s32.totalorder %s1662_s19, 5 }
  0x31   : > { %s1220_s20 = sadd.s32 4294967295, %s1662_s19   ;;  %p63_p3 = scmp.eq.s32.totalorder %s1751_s23, 0 }
  0x32   : > { %p1818_p10 = pnand %p1231_p2, %p168_p6  ;;  %p53_p12 = scmp.eq.s32.totalorder %s1220_s20, 0 }
  0x33   : > { %s65_s21 = sadd.s32 1, %s1630_s11  ;;  %p72_p4 = scmp.ne.s32.totalorder %s1630_s11, %s1626_s10 }
  0x34   : > { %p1830_p7 = por %p53_p12, %p52_p5  ;;  %p78_p9 = scmp.ne.s32.totalorder %s1626_s10, %s1622_s9 }
  0x35   : > { %s1837_s8 = scalar_select %p63_p3, %s1630_s11, %s65_s21  }
  0x36   : > { %s3208_s28 = scalar_select %p1830_p7, 1, 0 }
  0x37   : > { %p3209_p8 = scmp.eq.s32.totalorder %s1662_s19, 0  ;;  %p1841_p13 = por %p78_p9, %p53_p12 }
  0x38   : > { %s152_s27 = sand.u32 1, %s1630_s11   ;;  %s1230_s22 = sshll.u32 %s1654_s17, 5 }
  0x39   : > { %p74_p11 = por %p72_p4, %p3209_p8  ;;  %s1229_s29 = sshll.u32 %s152_s27, 1 }
  0x3a   : > { %s3210_s4 = scalar_select %p1841_p13, 1, 0 }
  0x3b   : > { %s1850_s12 = scalar_lea.hbm %s3134_s1, %s1230_s22  ;;  %s156_s9 = scalar_lea.vmem [#allocation6], %s1229_s29 }
  0x3c   : > { %s163_s30 = sshll.u32 %s156_s9, 4  ;;  %p3211_p5 = scmp.lt.s32.totalorder %s1662_s19, 4  ;;  %s1858_s30 = int_to_ptr.vmem [resolvable:$true] %s163_s30 }
  0x3d   : > { %s153_s6 = scalar_lea.sflag [#allocation7], %s152_s27  ;;  %s1538_s7 = scalar_lea.hbm %s1850_s12, 32 }
  0x3e   : > { %p1854_p0 = pnand %p3211_p5, %p74_p11  ;;  %p1539_p1 = scmp.ne.s32.totalorder %s1850_s12, %s1538_s7 }
  0x3f   : > { %s1543_s21 = scalar_lea.hbm %s3134_s1, 64  ;;  %p1544_p3 = scmp.lt.u32.totalorder %s1850_s12, %s3134_s1 }
  0x40   : > { %p1540_p2 = pneg %p1854_p0  ;;  %p1545_p4 = scmp.lt.u32.totalorder %s1543_s21, %s1538_s7 }
  0x41   : > { %p1547_p8 = scmp.lt.u32.totalorder %s1538_s7, %s1850_s12 }
  0x42   : > { %p1541_p6 = pnand %p1540_p2, %p1539_p1  ;;  %p1546_p9 = por %p1545_p4, %p1544_p3 }
  0x44   : > { %p1542_p12 = pneg %p1541_p6  ;;  %p1548_p11 = por %p1547_p8, %p1546_p9 }
  0x46   : > { %p1549_p5 = pnand %p1548_p11, %p1542_p12 }
  0x48   : > { %1552 = shalt.err (!%p1549_p5)
}
  0x49   : > { %s1553_s27 = scalar_lea.vmem %s1858_s30, 32  ;;  %s1667_s23 = smov [#allocation6]  }
  0x4a   : > { %p1554_p1 = scmp.ne.s32.totalorder %s1858_s30, %s1553_s27  ;;  %s1558_s25 = sshll.u32 %s1667_s23, 4  ;;  %s1559_s25 = int_to_ptr.vmem [resolvable:$false] %s1558_s25 }
  0x4b   : > { %s1560_s9 = scalar_lea.vmem %s1559_s25, 64  ;;  %p1561_p7 = scmp.lt.s32.totalorder %s1858_s30, %s1559_s25 }
  0x4c   : > { %p1556_p6 = pnand %p1554_p1, %p1540_p2  ;;  %p1562_p3 = scmp.lt.s32.totalorder %s1560_s9, %s1553_s27 }
  0x4e   : > { %p1557_p13 = pneg %p1556_p6  ;;  %p1563_p4 = por %p1562_p3, %p1561_p7 }
  0x50   : > { %p1564_p9 = pnand %p1563_p4, %p1557_p13 }
  0x52   : > { %1567 = shalt.err (!%p1564_p9)
}
  0x53   : > { %1250 = dma.hbm_to_vmem [thread:$0]  (!%p1854_p0), %s1850_s12, 32, %s1858_s30, %s153_s6  }
  0x54   : > { %172 = sbr.rel (%p1818_p10) target bundleno = 689 (0x2b1), region = 28 }
  0x5b   : > { %s174_s7 = sand.u32 1, %s1638_s13   ;;  %p3213_p2 = scmp.ne.s32.totalorder %s3208_s28, 0 }
  0x5c   : > { %s1232_s26 = sshll.u32 %s174_s7, 9  ;;  %s175_s20 = scalar_lea.sflag [#allocation5], %s174_s7 }
  0x5d   : > { %s1888_s21 = scalar_lea.vmem [#allocation4], %s1232_s26 }
  0x5e   : > { %1613 = dma.done.wait (%p3213_p2), %s175_s20, 8192  }
  0x5f   : > { %1615 = vsyncadd (%p3213_p2), %s175_s20, 4294959104  ;;  %s183_s3 = sand.u32 1, %s1626_s10   ;;  %p3214_p10 = scmp.ne.s32.totalorder %s3210_s4, 0 }
  0x60   : > { %s1895_s22 = sshll.u32 %s183_s3, 1  ;;  %s184_s24 = scalar_lea.sflag [#allocation7], %s183_s3 }
  0x61   : > { %s187_s12 = scalar_lea.vmem [#allocation6], %s1895_s22 }
  0x62   : > { %1617 = dma.done.wait (%p3214_p10), %s184_s24, 32  }
  0x63   : > { %1619 = vsyncadd (%p3214_p10), %s184_s24, 4294967264  ;;  %p212_p7 = scmp.lt.s32.totalorder %s1650_s16, 1  ;;  %p1234_p13 = scmp.ne.s32.totalorder %s1646_s15, 0 }
  0x64   : > { %v1668_v0 = vmov (!%p1234_p13), 0.0  }
  0x65   : > { %s1904_s30 = scalar_select %p212_p7, %s1650_s16, 1 }
  0x66   : > { %218 = sbr.rel (%p1234_p13) target bundleno = 109 (0x6d), region = 40  ;;  %219 = vst [vmem:[#allocation2] sm:$0x1] (!%p1234_p13), %v1668_v0  ;;  %220 = vst [vmem:[#allocation3] sm:$0x1] (!%p1234_p13), %v1668_v0 }
  0x67   : > { %s214_s29 = scalar_lea.vmem %s3135_s2, %s1904_s30 }
  0x6d PF: > { %v1912_v1 = vld [vmem:[%s1888_s21 + $0x40] sm:$0xff]  ;;  %v1915_v2 = vld [vmem:[%s1888_s21 + $0x48] sm:$0xff]  ;;  %v1918_v3 = vld [vmem:[%s1888_s21 + $0x50] sm:$0xff]  ;;  %s2172_s4 = scalar_lea.vmem %s187_s12, %s1650_s16 [#allocation6]  ;;  %p1236_p0 = scmp.ne.s32.totalorder %s1646_s15, 1 }
  0x6e   : > { %v297_v4 = vmax.f32 %v1912_v1, %v1915_v2  ;;  %v1923_v5 = vld [vmem:[%s1888_s21] sm:$0xff]  ;;  %v1926_v6 = vld [vmem:[%s1888_s21 + $0x8] sm:$0xff]  ;;  %v1929_v7 = vld [vmem:[%s1888_s21 + $0x58] sm:$0xff] }
  0x6f   : > { %v1932_v8 = vld [vmem:[%s1888_s21 + $0x10] sm:$0xff]  ;;  %v287_v9 = vmax.f32 %v1923_v5, %v1926_v6  ;;  %v1937_v10 = vld [vmem:[%s1888_s21 + $0x60] sm:$0xff]  ;;  %v1941_v12 = vld [vmem:[%s1888_s21 + $0x18] sm:$0xff] }
  0x70   : > { %v298_v11 = vmax.f32 %v297_v4, %v1918_v3  ;;  %v1944_v13 = vld [vmem:[%s1888_s21 + $0x68] sm:$0xff]  ;;  %v1947_v14 = vld [vmem:[%s1888_s21 + $0x70] sm:$0xff]  ;;  %v1953_v17 = vld [vmem:[%s1888_s21 + $0x20] sm:$0xff] }
  0x71   : > { %v288_v15 = vmax.f32 %v287_v9, %v1932_v8  ;;  %v302_v16 = vmax.f32 %v1937_v10, %v1944_v13  ;;  %v1956_v18 = vld [vmem:[%s1888_s21 + $0x28] sm:$0xff]  ;;  %v1959_v19 = vld [vmem:[%s1888_s21 + $0x30] sm:$0xff]  ;;  %v1963_v21 = vld [vmem:[%s1888_s21 + $0x78] sm:$0xff] }
  0x72   : > { %v299_v20 = vmax.f32 %v298_v11, %v1929_v7  ;;  %3215 = vst [vmem:[#allocation12_spill] sm:$0xff] %v1963_v21  ;;  %v292_v22 = vmax.f32 %v1953_v17, %v1956_v18  ;;  %v1968_v23 = vld [vmem:[%s1888_s21 + $0xa0] sm:$0xff]  ;;  %v1971_v24 = vld [vmem:[%s1888_s21 + $0xa8] sm:$0xff]  ;;  %v1976_v27 = vld [vmem:[%s1888_s21 + $0x38] sm:$0xff] }
  0x73   : > { %v289_v25 = vmax.f32 %v288_v15, %v1941_v12  ;;  %v303_v26 = vmax.f32 %v302_v16, %v1947_v14  ;;  %3216 = vst [vmem:[#allocation13_spill] sm:$0xff] %v1976_v27  ;;  %v1979_v28 = vld [vmem:[%s1888_s21 + $0xb0] sm:$0xff]  ;;  %v312_v29 = vmax.f32 %v1968_v23, %v1971_v24  ;;  %v1984_v30 = vld [vmem:[%s1888_s21 + $0x80] sm:$0xff]  ;;  %v1988_v32 = vld [vmem:[%s1888_s21 + $0xb8] sm:$0xff] }
  0x74   : > { %300 = vmax.xlane.f32.xlu1 %v299_v20  ;;  %v293_v31 = vmax.f32 %v292_v22, %v1959_v19  ;;  %3217 = vst [vmem:[#allocation14_spill] sm:$0xff] %v1988_v32  ;;  %v1991_v33 = vld [vmem:[%s1888_s21 + $0x88] sm:$0xff]  ;;  %v1994_v34 = vld [vmem:[%s1888_s21 + $0x90] sm:$0xff]  ;;  %v2001_v38 = vld [vmem:[%s1888_s21 + $0xe0] sm:$0xff] }
  0x75   : > { %290 = vmax.xlane.f32.xlu0 %v289_v25  ;;  %v304_v35 = vmax.f32 %v303_v26, %v1963_v21  ;;  %v313_v36 = vmax.f32 %v312_v29, %v1979_v28  ;;  %v307_v37 = vmax.f32 %v1984_v30, %v1991_v33  ;;  %v2004_v39 = vld [vmem:[%s1888_s21 + $0xe8] sm:$0xff]  ;;  %v2007_v40 = vld [vmem:[%s1888_s21 + $0xf0] sm:$0xff]  ;;  %v2011_v42 = vld [vmem:[%s1888_s21 + $0x98] sm:$0xff] }
  0x76   : > { %v294_v41 = vmax.f32 %v293_v31, %v1976_v27  ;;  %3218 = vst [vmem:[#allocation15_spill] sm:$0xff] %v2011_v42  ;;  %v322_v43 = vmax.f32 %v2001_v38, %v2004_v39  ;;  %v2016_v44 = vld [vmem:[%s1888_s21 + $0xc0] sm:$0xff]  ;;  %v2019_v45 = vld [vmem:[%s1888_s21 + $0xc8] sm:$0xff]  ;;  %v2023_v47 = vld [vmem:[%s1888_s21 + $0xd0] sm:$0xff] }
  0x77   : > { %v308_v46 = vmax.f32 %v307_v37, %v1994_v34  ;;  %v317_v48 = vmax.f32 %v2016_v44, %v2019_v45  ;;  %v2028_v49 = vld [vmem:[%s1888_s21 + $0x120] sm:$0xff]  ;;  %v314_v50 = vmax.f32 %v313_v36, %v1988_v32  ;;  %v2032_v51 = vld [vmem:[%s1888_s21 + $0xf8] sm:$0xff]  ;;  %v2039_v54 = vld [vmem:[%s1888_s21 + $0x128] sm:$0xff] }
  0x78   : > { %305 = vmax.xlane.f32.xlu1 %v304_v35  ;;  %3219 = vst [vmem:[#allocation16_spill] sm:$0xff] %v2032_v51  ;;  %v323_v52 = vmax.f32 %v322_v43, %v2007_v40  ;;  %v2036_v53 = vld [vmem:[%s1888_s21 + $0xd8] sm:$0xff]  ;;  %v2044_v57 = vld [vmem:[%s1888_s21 + $0x130] sm:$0xff]  ;;  %v332_v58 = vmax.f32 %v2028_v49, %v2039_v54  ;;  %v2049_v59 = vld [vmem:[%s1888_s21 + $0x100] sm:$0xff] }
  0x79   : > { %3220 = vst [vmem:[#allocation17_spill] sm:$0xff] %v2036_v53  ;;  %295 = vmax.xlane.f32.xlu0 %v294_v41  ;;  %v309_v55 = vmax.f32 %v308_v46, %v2011_v42  ;;  %v318_v56 = vmax.f32 %v317_v48, %v2023_v47  ;;  %v2052_v60 = vld [vmem:[%s1888_s21 + $0x108] sm:$0xff]  ;;  %v2055_v61 = vld [vmem:[%s1888_s21 + $0x110] sm:$0xff]  ;;  %v2060_v63 = vld [vmem:[%s1888_s21 + $0x160] sm:$0xff] }
  0x7a   : > { %v327_v62 = vmax.f32 %v2049_v59, %v2052_v60  ;;  %v2063_v0 = vld [vmem:[%s1888_s21 + $0x168] sm:$0xff]  ;;  %v2066_v4 = vld [vmem:[%s1888_s21 + $0x140] sm:$0xff]  ;;  %v324_v9 = vmax.f32 %v323_v52, %v2032_v51  ;;  %v2070_v11 = vld [vmem:[%s1888_s21 + $0x138] sm:$0xff]  ;;  %v333_v15 = vmax.f32 %v332_v58, %v2044_v57 }
  0x7b   : > { %v2074_v16 = vld [vmem:[%s1888_s21 + $0x118] sm:$0xff]  ;;  %v342_v20 = vmax.f32 %v2060_v63, %v2063_v0  ;;  %v2079_v22 = vld [vmem:[%s1888_s21 + $0x148] sm:$0xff]  ;;  %v319_v25 = vmax.f32 %v318_v56, %v2036_v53  ;;  %v2084_v29 = vld [vmem:[%s1888_s21 + $0x170] sm:$0xff] }
  0x7c   : > { %315 = vmax.xlane.f32.xlu1 %v314_v50  ;;  %v328_v26 = vmax.f32 %v327_v62, %v2055_v61  ;;  %v337_v31 = vmax.f32 %v2066_v4, %v2079_v22  ;;  %v2089_v35 = vld [vmem:[%s1888_s21 + $0x1a0] sm:$0xff]  ;;  %v2092_v36 = vld [vmem:[%s1888_s21 + $0x1a8] sm:$0xff]  ;;  %v2095_v37 = vld [vmem:[%s1888_s21 + $0x150] sm:$0xff]  ;;  %v334_v46 = vmax.f32 %v333_v15, %v2070_v11 }
  0x7d   : > { %310 = vmax.xlane.f32.xlu0 %v309_v55  ;;  %v2098_v41 = vld [vmem:[%s1888_s21 + $0x180] sm:$0xff]  ;;  %v2101_v43 = vld [vmem:[%s1888_s21 + $0x188] sm:$0xff]  ;;  %v2105_v48 = vld [vmem:[%s1888_s21 + $0x178] sm:$0xff]  ;;  %v343_v50 = vmax.f32 %v342_v20, %v2084_v29  ;;  %v352_v55 = vmax.f32 %v2089_v35, %v2092_v36 }
  0x7e   : > { %3221 = vst [vmem:[#allocation18_spill] sm:$0xff] %v2098_v41  ;;  %3222 = vst [vmem:[#allocation19_spill] sm:$0xff] %v2101_v43  ;;  %v2109_v52 = vld [vmem:[%s1888_s21 + $0x158] sm:$0xff]  ;;  %v329_v56 = vmax.f32 %v328_v26, %v2074_v16  ;;  %v338_v58 = vmax.f32 %v337_v31, %v2095_v37  ;;  %v2116_v62 = vld [vmem:[%s1888_s21 + $0x1b0] sm:$0xff] }
  0x7f   : > { %v2121_v15 = vld [vmem:[%s1888_s21 + $0x1e0] sm:$0xff]  ;;  %v2124_v20 = vld [vmem:[%s1888_s21 + $0x1e8] sm:$0xff]  ;;  %v2127_v51 = vld [vmem:[%s1888_s21 + $0x190] sm:$0xff]  ;;  %v344_v26 = vmax.f32 %v343_v50, %v2105_v48  ;;  %v353_v31 = vmax.f32 %v352_v55, %v2116_v62 }
  0x80   : > { %325 = vmax.xlane.f32.xlu1 %v324_v9  ;;  %v347_v9 = vmax.f32 %v2098_v41, %v2101_v43  ;;  %3223 = vst [vmem:[#allocation20_spill] sm:$0xff] %v2121_v15  ;;  %3224 = vst [vmem:[#allocation21_spill] sm:$0xff] %v2124_v20  ;;  %v2133_v53 = vld [vmem:[%s1888_s21 + $0x1c8] sm:$0xff]  ;;  %v362_v32 = vmax.f32 %v2121_v15, %v2124_v20  ;;  %v339_v42 = vmax.f32 %v338_v58, %v2109_v52  ;;  %v2141_v21 = vld [vmem:[%s1888_s21 + $0x1b8] sm:$0xff] }
  0x81   : > { %320 = vmax.xlane.f32.xlu0 %v319_v25  ;;  %v2130_v25 = vld [vmem:[%s1888_s21 + $0x1c0] sm:$0xff]  ;;  %3226 = vst [vmem:[#allocation23_spill] sm:$0xff] %v2133_v53  ;;  %v2145_v43 = vld [vmem:[%s1888_s21 + $0x1f0] sm:$0xff]  ;;  %v2150_v50 = vld [vmem:[%s1888_s21 + $0x198] sm:$0xff]  ;;  %v354_v55 = vmax.f32 %v353_v31, %v2141_v21  ;;  %v671_v31 = vlaneseq }
  0x82   : > { %3225 = vst [vmem:[#allocation22_spill] sm:$0xff] %v2130_v25  ;;  %v348_v27 = vmax.f32 %v347_v9, %v2127_v51  ;;  %v2153_v41 = vld [vmem:[%s1888_s21 + $0x1d0] sm:$0xff]  ;;  %v2159_v9 = vld [vmem:[%s1888_s21 + $0x1f8] sm:$0xff] }
  0x83   : > { %v2163_v15 = vld [vmem:[%s1888_s21 + $0x1d8] sm:$0xff] }
  0x84   : > { %335 = vmax.xlane.f32.xlu1 %v334_v46  ;;  %v357_v46 = vmax.f32 %v2130_v25, %v2133_v53  ;;  %v349_v58 = vmax.f32 %v348_v27, %v2150_v50  ;;  %3227 = vst [vmem:[#allocation24_spill] sm:$0xff] %v2163_v15  ;;  %v2167_v25 = vshrl.u32 %v671_v31, 7  ;;  %v1507_v27 = vld [vmem:[%s2172_s4] ss:$0 sm:$0xff] }
  0x85   : > { %330 = vmax.xlane.f32.xlu0 %v329_v56  ;;  %v363_v56 = vmax.f32 %v362_v32, %v2145_v43 }
  0x86   : > { %v358_v20 = vmax.f32 %v357_v46, %v2153_v41  ;;  %3228 = vst [vmem:[#allocation25_spill] sm:$0xff] %v2167_v25 }
  0x87   : > { %v364_v53 = vmax.f32 %v363_v56, %v2159_v9 }
  0x88   : > { %345 = vmax.xlane.f32.xlu1 %v344_v26  ;;  %v359_v26 = vmax.f32 %v358_v20, %v2163_v15 }
  0x89   : > { %340 = vmax.xlane.f32.xlu0 %v339_v42 }
  0x8c   : > { %355 = vmax.xlane.f32.xlu1 %v354_v55 }
  0x8d   : > { %350 = vmax.xlane.f32.xlu0 %v349_v58 }
  0x90   : > { %365 = vmax.xlane.f32.xlu1 %v364_v53 }
  0x91   : > { %360 = vmax.xlane.f32.xlu0 %v359_v26 }
  0xa1   : > { %685 = vbcast.lane.b32.xlu1 %v1507_v27, 264 }
  0xa5   : > { %689 = vbcast.lane.b32.xlu1 %v1507_v27, 272 }
  0xa7   : > { %681 = vbcast.lane.b32.xlu0 %v1507_v27, 256 }
  0xa9   : > { %693 = vbcast.lane.b32.xlu1 %v1507_v27, 280 }
  0xab   : > { %697 = vbcast.lane.b32.xlu0 %v1507_v27, 288 }
  0xad   : > { %701 = vbcast.lane.b32.xlu1 %v1507_v27, 296 }
  0xaf   : > { %705 = vbcast.lane.b32.xlu0 %v1507_v27, 304 }
  0xb1   : > { %709 = vbcast.lane.b32.xlu1 %v1507_v27, 312 }
  0xb3   : > { %713 = vbcast.lane.b32.xlu0 %v1507_v27, 320 }
  0xb5   : > { %717 = vbcast.lane.b32.xlu1 %v1507_v27, 328 }
  0xb7   : > { %721 = vbcast.lane.b32.xlu0 %v1507_v27, 336 }
  0xb9   : > { %725 = vbcast.lane.b32.xlu1 %v1507_v27, 344 }
  0xbb   : > { %729 = vbcast.lane.b32.xlu0 %v1507_v27, 352 }
  0xbd   : > { %733 = vbcast.lane.b32.xlu1 %v1507_v27, 360 }
  0xbf   : > { %737 = vbcast.lane.b32.xlu0 %v1507_v27, 368 }
  0xc1   : > { %741 = vbcast.lane.b32.xlu1 %v1507_v27, 376 }
 0x101   : > { %v2175_v32 = vpop.xlane.xlu1 %300 }
 0x102   : > { %v2179_v42 = vsub.f32 %v1912_v1, %v2175_v32  ;;  %v2183_v53 = vsub.f32 %v1915_v2, %v2175_v32  ;;  %v2187_v20 = vsub.f32 %v1918_v3, %v2175_v32  ;;  %v2189_v46 = vpop.xlane.xlu0 %290 }
 0x103   : > { %v2193_v55 = vsub.f32 %v1923_v5, %v2189_v46  ;;  %v2198_v1 = vsub.f32 %v1926_v6, %v2189_v46  ;;  %v2203_v2 = vsub.f32 %v1932_v8, %v2189_v46 }
 0x104   : > { %3229 = vst [vmem:[#allocation26_spill] sm:$0xff] %v2179_v42  ;;  %3230 = vst [vmem:[#allocation27_spill] sm:$0xff] %v2183_v53  ;;  %v447_v56 = vmul.f32 1.442695, %v2179_v42  ;;  %v449_v58 = vmul.f32 1.442695, %v2183_v53 }
 0x105   : > { %3231 = vst [vmem:[#allocation28_spill] sm:$0xff] %v2187_v20  ;;  %v2205_v3 = vpop.xlane.xlu1 %305  ;;  %v451_v26 = vmul.f32 1.442695, %v2187_v20  ;;  %v431_v25 = vmul.f32 1.442695, %v2193_v55 }
 0x106   : > { %3232 = vst [vmem:[#allocation29_spill] sm:$0xff] %v2205_v3  ;;  %v2210_v5 = vsub.f32 %v1937_v10, %v2205_v3  ;;  %v2212_v27 = vpop.xlane.xlu0 %295  ;;  %v2217_v6 = vsub.f32 %v1944_v13, %v2205_v3  ;;  %1344 = vpow2.f32 %v447_v56  ;;  %v433_v8 = vmul.f32 1.442695, %v2198_v1 }
 0x107   : > { %v2222_v53 = vsub.f32 %v1947_v14, %v2205_v3  ;;  %1346 = vpow2.f32 %v449_v58  ;;  %v435_v20 = vmul.f32 1.442695, %v2203_v2  ;;  %v2227_v10 = vsub.f32 %v1953_v17, %v2212_v27 }
 0x108   : > { %3233 = vst [vmem:[#allocation30_spill] sm:$0xff] %v2217_v6  ;;  %1348 = vpow2.f32 %v451_v26  ;;  %v455_v13 = vmul.f32 1.442695, %v2210_v5  ;;  %v2234_v56 = vsub.f32 %v1956_v18, %v2212_v27  ;;  %v457_v14 = vmul.f32 1.442695, %v2217_v6 }
 0x109   : > { %3234 = vst [vmem:[#allocation31_spill] sm:$0xff] %v2222_v53  ;;  %v2229_v42 = vpop.xlane.xlu1 %315  ;;  %1350 = vpow2.f32 %v431_v25  ;;  %v2241_v58 = vsub.f32 %v1959_v19, %v2212_v27  ;;  %v459_v17 = vmul.f32 1.442695, %v2222_v53  ;;  %v2248_v3 = vand.u32 127, %v671_v31 }
 0x10a   : > { %3235 = vst [vmem:[#allocation32_spill] sm:$0xff] %v2229_v42  ;;  %v2236_v15 = vpop.xlane.xlu0 %310  ;;  %1352 = vpow2.f32 %v433_v8  ;;  %v2246_v26 = vsub.f32 %v1968_v23, %v2229_v42  ;;  %v439_v18 = vmul.f32 1.442695, %v2227_v10  ;;  %v2253_v25 = vsub.f32 %v1971_v24, %v2229_v42 }
 0x10b   : > { %3236 = vst [vmem:[#allocation33_spill] sm:$0xff] %v2236_v15  ;;  %1354 = vpow2.f32 %v435_v20  ;;  %v441_v19 = vmul.f32 1.442695, %v2234_v56  ;;  %v2260_v8 = vsub.f32 %v1979_v28, %v2229_v42  ;;  %v443_v31 = vmul.f32 1.442695, %v2241_v58 }
 0x10c   : > { %3237 = vst [vmem:[#allocation34_spill] sm:$0xff] %v2246_v26  ;;  %3238 = vst [vmem:[#allocation35_spill] sm:$0xff] %v2253_v25  ;;  %1356 = vpow2.f32 %v455_v13  ;;  %v2267_v20 = vsub.f32 %v1984_v30, %v2236_v15  ;;  %v471_v24 = vmul.f32 1.442695, %v2246_v26  ;;  %v2272_v13 = vsub.f32 %v1991_v33, %v2236_v15 }
 0x10d   : > { %v2255_v6 = vpop.xlane.xlu1 %325  ;;  %3240 = vst [vmem:[#allocation37_spill] sm:$0xff] %v2260_v8  ;;  %1358 = vpow2.f32 %v457_v14  ;;  %v473_v28 = vmul.f32 1.442695, %v2253_v25  ;;  %v2277_v42 = vsub.f32 %v1994_v34, %v2236_v15  ;;  %v2280_v53 = vadd.s32 128, %v2248_v3 }
 0x10e   : > { %3239 = vst [vmem:[#allocation36_spill] sm:$0xff] %v2255_v6  ;;  %v2262_v23 = vpop.xlane.xlu0 %320  ;;  %3242 = vst [vmem:[#allocation39_spill] sm:$0xff] %v2267_v20  ;;  %1360 = vpow2.f32 %v459_v17  ;;  %v475_v17 = vmul.f32 1.442695, %v2260_v8  ;;  %v2287_v33 = vsub.f32 %v2001_v38, %v2255_v6  ;;  %v2290_v25 = vadd.s32 256, %v2248_v3 }
 0x10f   : > { %3241 = vst [vmem:[#allocation38_spill] sm:$0xff] %v2262_v23  ;;  %1362 = vpow2.f32 %v439_v18  ;;  %v463_v34 = vmul.f32 1.442695, %v2267_v20  ;;  %v2297_v15 = vsub.f32 %v2004_v39, %v2255_v6  ;;  %v465_v38 = vmul.f32 1.442695, %v2272_v13 }
 0x110   : > { %v2282_v30 = vpop.eup %1344  ;;  %1364 = vpow2.f32 %v441_v19  ;;  %3244 = vst [vmem:[#allocation41_spill] sm:$0xff] %v2287_v33  ;;  %v2300_v19 = vadd.s32 384, %v2248_v3  ;;  %v2307_v8 = vsub.f32 %v2007_v40, %v2255_v6  ;;  %v467_v39 = vmul.f32 1.442695, %v2277_v42 }
 0x111   : > { %v336_v14 = vpop.xlane.xlu1 %335  ;;  %3243 = vst [vmem:[#allocation40_spill] sm:$0xff] %v2282_v30  ;;  %v2292_v26 = vpop.eup %1346  ;;  %1366 = vpow2.f32 %v443_v31  ;;  %v2311_v31 = vsub.f32 %v2016_v44, %v2262_v23  ;;  %v2318_v20 = vsub.f32 %v2019_v45, %v2262_v23  ;;  %v487_v44 = vmul.f32 1.442695, %v2287_v33 }
 0x112   : > { %v331_v18 = vpop.xlane.xlu0 %330  ;;  %3245 = vst [vmem:[#allocation42_spill] sm:$0xff] %v2292_v26  ;;  %v2302_v30 = vpop.eup %1348  ;;  %1368 = vpow2.f32 %v471_v24  ;;  %3247 = vst [vmem:[#allocation44_spill] sm:$0xff] %v2307_v8  ;;  %v2322_v24 = vsub.f32 %v2023_v47, %v2262_v23  ;;  %v2328_v6 = vsub.f32 %v2028_v49, %v336_v14  ;;  %v489_v47 = vmul.f32 1.442695, %v2297_v15 }
 0x113   : > { %3246 = vst [vmem:[#allocation43_spill] sm:$0xff] %v2302_v30  ;;  %v2313_v26 = vpop.eup %1350  ;;  %1370 = vpow2.f32 %v473_v28  ;;  %v2338_v23 = vsub.f32 %v2039_v54, %v336_v14  ;;  %v491_v49 = vmul.f32 1.442695, %v2307_v8  ;;  %v479_v33 = vmul.f32 1.442695, %v2311_v31 }
 0x114   : > { %3248 = vst [vmem:[#allocation45_spill] sm:$0xff] %v2313_v26  ;;  %v2324_v40 = vpop.eup %1352  ;;  %1372 = vpow2.f32 %v475_v17  ;;  %3250 = vst [vmem:[#allocation47_spill] sm:$0xff] %v2328_v6  ;;  %v2332_v26 = vsub.f32 %v1929_v7, %v2175_v32  ;;  %v2341_v17 = vsub.f32 %v2044_v57, %v336_v14  ;;  %v2349_v7 = vsub.f32 %v1941_v12, %v2189_v46 }
 0x115   : > { %v346_v30 = vpop.xlane.xlu1 %345  ;;  %3249 = vst [vmem:[#allocation46_spill] sm:$0xff] %v2324_v40  ;;  %v2334_v45 = vpop.eup %1354  ;;  %1374 = vpow2.f32 %v463_v34  ;;  %3252 = vst [vmem:[#allocation49_spill] sm:$0xff] %v2338_v23  ;;  %v481_v54 = vmul.f32 1.442695, %v2318_v20  ;;  %v483_v34 = vmul.f32 1.442695, %v2322_v24  ;;  %v2356_v57 = vsub.f32 %v2070_v11, %v336_v14 }
 0x116   : > { %v341_v28 = vpop.xlane.xlu0 %340  ;;  %3251 = vst [vmem:[#allocation48_spill] sm:$0xff] %v2334_v45  ;;  %3253 = vst [vmem:[#allocation50_spill] sm:$0xff] %v2341_v17  ;;  %v2343_v40 = vpop.eup %1356  ;;  %1376 = vpow2.f32 %v465_v38  ;;  %v503_v45 = vmul.f32 1.442695, %v2328_v6  ;;  %v2362_v8 = vsub.f32 %v2049_v59, %v331_v18  ;;  %v2365_v12 = vsub.f32 %v2052_v60, %v331_v18 }
 0x117   : > { %3254 = vst [vmem:[#allocation51_spill] sm:$0xff] %v2343_v40  ;;  %v2351_v32 = vpop.eup %1358  ;;  %1378 = vpow2.f32 %v467_v39  ;;  %3255 = vst [vmem:[#allocation52_spill] sm:$0xff] %v2356_v57  ;;  %v505_v39 = vmul.f32 1.442695, %v2338_v23  ;;  %v507_v11 = vmul.f32 1.442695, %v2341_v17  ;;  %v2372_v14 = vsub.f32 %v2055_v61, %v331_v18 }
 0x118   : > { %v2358_v38 = vpop.eup %1360  ;;  %1380 = vpow2.f32 %v487_v44  ;;  %3257 = vst [vmem:[#allocation54_spill] sm:$0xff] %v2362_v8  ;;  %3258 = vst [vmem:[#allocation55_spill] sm:$0xff] %v2365_v12  ;;  %v2377_v44 = vsub.f32 %v2074_v16, %v331_v18  ;;  %v2380_v59 = vsub.f32 %v2060_v63, %v346_v30  ;;  %v2383_v60 = vsub.f32 %v2063_v0, %v346_v30 }
 0x119   : > { %v356_v40 = vpop.xlane.xlu1 %355  ;;  %3256 = vst [vmem:[#allocation53_spill] sm:$0xff] %v2358_v38  ;;  %v2367_v46 = vpop.eup %1362  ;;  %1382 = vpow2.f32 %v489_v47  ;;  %3259 = vst [vmem:[#allocation56_spill] sm:$0xff] %v2372_v14  ;;  %v509_v17 = vmul.f32 1.442695, %v2356_v57  ;;  %v2389_v61 = vsub.f32 %v2084_v29, %v346_v30  ;;  %v495_v63 = vmul.f32 1.442695, %v2362_v8 }
 0x11a   : > { %v2374_v38 = vpop.eup %1364  ;;  %1384 = vpow2.f32 %v491_v49  ;;  %3260 = vst [vmem:[#allocation57_spill] sm:$0xff] %v2377_v44  ;;  %3261 = vst [vmem:[#allocation58_spill] sm:$0xff] %v2380_v59  ;;  %v351_v47 = vpop.xlane.xlu0 %350  ;;  %v2392_v49 = vsub.f32 %v2105_v48, %v346_v30  ;;  %v497_v0 = vmul.f32 1.442695, %v2365_v12  ;;  %v2399_v18 = vsub.f32 %v2066_v4, %v341_v28 }
 0x11b   : > { %3262 = vst [vmem:[#allocation59_spill] sm:$0xff] %v2383_v60  ;;  %v2385_v6 = vpop.eup %1366  ;;  %1386 = vpow2.f32 %v479_v33  ;;  %3263 = vst [vmem:[#allocation60_spill] sm:$0xff] %v2389_v61  ;;  %v499_v33 = vmul.f32 1.442695, %v2372_v14  ;;  %v2405_v29 = vsub.f32 %v2079_v22, %v341_v28  ;;  %v2408_v48 = vsub.f32 %v2095_v37, %v341_v28 }
 0x11c   : > { %3264 = vst [vmem:[#allocation61_spill] sm:$0xff] %v2392_v49  ;;  %v2394_v16 = vpop.eup %1368  ;;  %1388 = vpow2.f32 %v481_v54  ;;  %3265 = vst [vmem:[#allocation62_spill] sm:$0xff] %v2399_v18  ;;  %v501_v57 = vmul.f32 1.442695, %v2377_v44  ;;  %v519_v4 = vmul.f32 1.442695, %v2380_v59  ;;  %v2420_v37 = vsub.f32 %v2109_v52, %v341_v28 }
 0x11d   : > { %v2401_v23 = vpop.eup %1370  ;;  %1390 = vpow2.f32 %v483_v34  ;;  %3266 = vst [vmem:[#allocation63_spill] sm:$0xff] %v2405_v29  ;;  %3267 = vst [vmem:[#allocation64_spill] sm:$0xff] %v2408_v48  ;;  %v366_v30 = vpop.xlane.xlu1 %365  ;;  %v521_v12 = vmul.f32 1.442695, %v2383_v60  ;;  %v523_v34 = vmul.f32 1.442695, %v2389_v61  ;;  %v2426_v44 = vsub.f32 %v2089_v35, %v356_v40 }
 0x11e   : > { %v2410_v54 = vpop.eup %1372  ;;  %1392 = vpow2.f32 %v503_v45  ;;  %v525_v22 = vmul.f32 1.442695, %v2392_v49  ;;  %3269 = vst [vmem:[#allocation66_spill] sm:$0xff] %v2420_v37  ;;  %v511_v45 = vmul.f32 1.442695, %v2399_v18  ;;  %v2429_v60 = vsub.f32 %v2092_v36, %v356_v40  ;;  %v2431_v59 = vpop.xlane.xlu0 %360  ;;  %v3275_v36 = vld [vmem:[#allocation18_spill] sm:$0xff] }
 0x11f   : > { %3268 = vst [vmem:[#allocation65_spill] sm:$0xff] %v2410_v54  ;;  %v2415_v8 = vpop.eup %1374  ;;  %1394 = vpow2.f32 %v505_v39  ;;  %3270 = vst [vmem:[#allocation67_spill] sm:$0xff] %v2426_v44  ;;  %v513_v49 = vmul.f32 1.442695, %v2405_v29  ;;  %v515_v52 = vmul.f32 1.442695, %v2408_v48  ;;  %v2438_v28 = vsub.f32 %v2116_v62, %v356_v40 }
 0x120   : > { %v2422_v14 = vpop.eup %1376  ;;  %1396 = vpow2.f32 %v507_v11  ;;  %3271 = vst [vmem:[#allocation68_spill] sm:$0xff] %v2429_v60  ;;  %v2443_v35 = vsub.f32 %v2141_v21, %v356_v40  ;;  %v2446_v18 = vsub.f32 %v3275_v36, %v351_v47  ;;  %v3277_v61 = vld [vmem:[#allocation19_spill] sm:$0xff]  ;;  %v517_v48 = vmul.f32 1.442695, %v2420_v37  ;;  %v3282_v36 = vld [vmem:[#allocation20_spill] sm:$0xff]  ;;  %v3284_v37 = vld [vmem:[#allocation21_spill] sm:$0xff] }
 0x121   : > { %v2433_v39 = vpop.eup %1378  ;;  %1398 = vpow2.f32 %v509_v17  ;;  %3273 = vst [vmem:[#allocation70_spill] sm:$0xff] %v2438_v28  ;;  %v2449_v54 = vsub.f32 %v3277_v61, %v351_v47  ;;  %v2455_v62 = vsub.f32 %v2127_v51, %v351_v47  ;;  %v2458_v29 = vsub.f32 %v2150_v50, %v351_v47 }
 0x122   : > { %3272 = vst [vmem:[#allocation69_spill] sm:$0xff] %v2433_v39  ;;  %v2440_v11 = vpop.eup %1380  ;;  %1400 = vpow2.f32 %v495_v63  ;;  %3274 = vst [vmem:[#allocation71_spill] sm:$0xff] %v2443_v35  ;;  %v2460_v63 = vpop.permute.xlu1 %685  ;;  %v535_v40 = vmul.f32 1.442695, %v2426_v44  ;;  %v537_v61 = vmul.f32 1.442695, %v2429_v60  ;;  %v2467_v39 = vsub.f32 %v3282_v36, %v366_v30 }
 0x123   : > { %3276 = vst [vmem:[#allocation18_spill] sm:$0xff] %v2446_v18  ;;  %3278 = vst [vmem:[#allocation19_spill] sm:$0xff] %v2449_v54  ;;  %v2451_v17 = vpop.eup %1382  ;;  %1402 = vpow2.f32 %v497_v0  ;;  %v539_v51 = vmul.f32 1.442695, %v2438_v28  ;;  %v2473_v50 = vsub.f32 %v3284_v37, %v366_v30  ;;  %v2476_v47 = vsub.f32 %v2145_v43, %v366_v30 }
 0x124   : > { %3279 = vst [vmem:[#allocation72_spill] sm:$0xff] %v2455_v62  ;;  %3280 = vst [vmem:[#allocation73_spill] sm:$0xff] %v2458_v29  ;;  %v2462_v21 = vpop.eup %1384  ;;  %1404 = vpow2.f32 %v499_v33  ;;  %v2481_v33 = vmul.f32 1.442695, %v2443_v35  ;;  %v2484_v36 = vmul.f32 1.442695, %v2446_v18  ;;  %vm747_vm0 = vcmp.eq.s32.totalorder %v2248_v3, %v2460_v63 }
 0x125   : > { %3281 = vst [vmem:[#allocation74_spill] sm:$0xff] %v2462_v21  ;;  %3283 = vst [vmem:[#allocation20_spill] sm:$0xff] %v2467_v39  ;;  %v2469_v0 = vpop.eup %1386  ;;  %1406 = vpow2.f32 %v501_v57  ;;  %v2487_v60 = vmul.f32 1.442695, %v2449_v54  ;;  %v682_v57 = vpop.permute.xlu0 %681  ;;  %v2492_v37 = vmul.f32 1.442695, %v2455_v62  ;;  %v2502_v18 = vsub.f32 %v2159_v9, %v366_v30 }
 0x126   : > { %3285 = vst [vmem:[#allocation21_spill] sm:$0xff] %v2473_v50  ;;  %3286 = vst [vmem:[#allocation75_spill] sm:$0xff] %v2476_v47  ;;  %v2478_v21 = vpop.eup %1388  ;;  %1408 = vpow2.f32 %v519_v4  ;;  %v2495_v43 = vmul.f32 1.442695, %v2458_v29  ;;  %v2505_v54 = vmul.f32 1.442695, %v2467_v39  ;;  %vm748_vm1 = vcmp.eq.s32.totalorder %v2280_v53, %v2460_v63 }
 0x127   : > { %v2489_v28 = vpop.eup %1390  ;;  %1410 = vpow2.f32 %v521_v12  ;;  %3287 = vst [vmem:[#allocation76_spill] sm:$0xff] %v2502_v18  ;;  %v2512_v29 = vmul.f32 1.442695, %v2473_v50  ;;  %v2515_v62 = vmul.f32 1.442695, %v2476_v47  ;;  %vm743_vm2 = vcmp.eq.s32.totalorder %v2248_v3, %v682_v57  ;;  %v3289_v47 = vld [vmem:[#allocation22_spill] sm:$0xff] }
 0x128   : > { %v2499_v4 = vpop.eup %1392  ;;  %1412 = vpow2.f32 %v523_v34  ;;  %v2518_v34 = vpop.permute.xlu1 %689  ;;  %vm744_vm3 = vcmp.eq.s32.totalorder %v2280_v53, %v682_v57  ;;  %vm749_vm4 = vcmp.eq.s32.totalorder %v2290_v25, %v2460_v63  ;;  %v811_v30 = vsel %vm747_vm0, %v2227_v10, 0.0  ;;  %v3291_v39 = vld [vmem:[#allocation23_spill] sm:$0xff]  ;;  %v3293_v10 = vld [vmem:[#allocation13_spill] sm:$0xff] }
 0x129   : > { %v2509_v12 = vpop.eup %1394  ;;  %1414 = vpow2.f32 %v525_v22  ;;  %v2533_v50 = vsub.f32 %v3289_v47, %v2431_v59  ;;  %v812_v35 = vsel %vm748_vm1, %v2234_v56, 0.0  ;;  %vm750_vm5 = vcmp.eq.s32.totalorder %v2300_v19, %v2460_v63 }
 0x12a   : > { %v2520_v9 = vpop.eup %1396  ;;  %1416 = vpow2.f32 %v511_v45  ;;  %v2537_v45 = vsub.f32 %v3291_v39, %v2431_v59  ;;  %v813_v39 = vsel %vm749_vm4, %v2241_v58, 0.0  ;;  %vm745_vm6 = vcmp.eq.s32.totalorder %v2290_v25, %v682_v57  ;;  %v2567_v58 = vpop.permute.xlu0 %697 }
 0x12b   : > { %v2529_v22 = vpop.eup %1398  ;;  %1418 = vpow2.f32 %v513_v49  ;;  %3290 = vst [vmem:[#allocation22_spill] sm:$0xff] %v2533_v50  ;;  %v876_v49 = vadd.f32 %v812_v35, %v811_v30  ;;  %v807_v56 = vsel %vm743_vm2, %v2193_v55, 0.0  ;;  %vm751_vm7 = vcmp.eq.s32.totalorder %v2248_v3, %v2518_v34 }
 0x12c   : > { %3288 = vst [vmem:[#allocation77_spill] sm:$0xff] %v2529_v22  ;;  %3292 = vst [vmem:[#allocation23_spill] sm:$0xff] %v2537_v45  ;;  %v2543_v44 = vpop.eup %1400  ;;  %1420 = vpow2.f32 %v515_v52  ;;  %v2547_v22 = vsub.f32 %v3293_v10, %v2212_v27  ;;  %v808_v52 = vsel %vm744_vm3, %v2198_v1, 0.0  ;;  %vm752_vm8 = vcmp.eq.s32.totalorder %v2280_v53, %v2518_v34  ;;  %v2571_v55 = vpop.permute.xlu1 %693 }
 0x12d   : > { %v2551_v47 = vpop.eup %1402  ;;  %1422 = vpow2.f32 %v517_v48  ;;  %v877_v35 = vadd.f32 %v876_v49, %v813_v39  ;;  %vm746_vm9 = vcmp.eq.s32.totalorder %v2300_v19, %v682_v57  ;;  %v871_v48 = vadd.f32 %v808_v52, %v807_v56  ;;  %v3297_v56 = vld [vmem:[#allocation24_spill] sm:$0xff] }
 0x12e   : > { %v2561_v27 = vpop.eup %1404  ;;  %1424 = vpow2.f32 %v535_v40  ;;  %v814_v1 = vsel %vm750_vm5, %v2547_v22, 0.0  ;;  %v809_v40 = vsel %vm745_vm6, %v2203_v2, 0.0  ;;  %v2590_v63 = vsub.f32 %v2153_v41, %v2431_v59  ;;  %v3298_v2 = vld [vmem:[#allocation26_spill] sm:$0xff]  ;;  %v3299_v41 = vld [vmem:[#allocation27_spill] sm:$0xff] }
 0x12f   : > { %3294 = vst [vmem:[#allocation13_spill] sm:$0xff] %v2561_v27  ;;  %v2569_v30 = vpop.eup %1406  ;;  %1426 = vpow2.f32 %v537_v61  ;;  %v2581_v27 = vmul.f32 1.442695, %v2502_v18  ;;  %v878_v49 = vadd.f32 %v877_v35, %v814_v1  ;;  %v2594_v52 = vsub.f32 %v3297_v56, %v2431_v59 }
 0x130   : > { %3295 = vst [vmem:[#allocation78_spill] sm:$0xff] %v2569_v30  ;;  %v2578_v10 = vpop.eup %1408  ;;  %1428 = vpow2.f32 %v539_v51  ;;  %3296 = vst [vmem:[#allocation79_spill] sm:$0xff] %v2590_v63  ;;  %v872_v61 = vadd.f32 %v871_v48, %v809_v40  ;;  %v810_v35 = vsel %vm746_vm9, %v2349_v7, 0.0  ;;  %vm753_vm10 = vcmp.eq.s32.totalorder %v2290_v25, %v2518_v34  ;;  %v2622_v40 = vpop.permute.xlu0 %705 }
 0x131   : > { %v2586_v39 = vpop.eup %1410  ;;  %879 = vadd.xlane.f32.xlu0 %v878_v49  ;;  %v815_v51 = vsel %vm751_vm7, %v3298_v2, 0.0  ;;  %v816_v59 = vsel %vm752_vm8, %v3299_v41, 0.0  ;;  %1430 = vpow2.f32 %v2481_v33  ;;  %v2613_v1 = vmul.f32 1.442695, %v2533_v50 }
 0x132   : > { %v2596_v30 = vpop.eup %1412  ;;  %vm755_vm11 = vcmp.eq.s32.totalorder %v2248_v3, %v2571_v55  ;;  %v873_v48 = vadd.f32 %v872_v61, %v810_v35  ;;  %1432 = vpow2.f32 %v2484_v36  ;;  %vm756_vm12 = vcmp.eq.s32.totalorder %v2280_v53, %v2571_v55  ;;  %v2635_v36 = vpop.permute.xlu1 %701  ;;  %v3301_v35 = vld [vmem:[#allocation28_spill] sm:$0xff] }
 0x133   : > { %v2609_v57 = vpop.eup %1414  ;;  %vm754_vm13 = vcmp.eq.s32.totalorder %v2300_v19, %v2518_v34  ;;  %v881_v33 = vadd.f32 %v816_v59, %v815_v51  ;;  %1434 = vpow2.f32 %v2487_v60  ;;  %v2630_v2 = vmul.f32 1.442695, %v2537_v45  ;;  %v3302_v34 = vld [vmem:[#allocation30_spill] sm:$0xff]  ;;  %v3305_v45 = vld [vmem:[#allocation12_spill] sm:$0xff] }
 0x134   : > { %3300 = vst [vmem:[#allocation24_spill] sm:$0xff] %v2609_v57  ;;  %v2617_v49 = vpop.eup %1416  ;;  %v2633_v61 = vmul.f32 1.442695, %v2590_v63  ;;  %874 = vadd.xlane.f32.xlu1 %v873_v48  ;;  %v817_v41 = vsel %vm753_vm10, %v3301_v35, 0.0  ;;  %1436 = vpow2.f32 %v2492_v37  ;;  %vm759_vm14 = vcmp.eq.s32.totalorder %v2248_v3, %v2567_v58 }
 0x135   : > { %v2626_v56 = vpop.eup %1418  ;;  %vm760_vm15 = vcmp.eq.s32.totalorder %v2280_v53, %v2567_v58  ;;  %v882_v60 = vadd.f32 %v881_v33, %v817_v41  ;;  %vm767_vm0 = vcmp.eq.s32.totalorder %v2248_v3, %v2622_v40  ;;  %v818_v51 = vsel %vm754_vm13, %v2332_v26, 0.0 }
 0x136   : > { %v2641_v50 = vpop.eup %1420  ;;  %vm757_vm1 = vcmp.eq.s32.totalorder %v2290_v25, %v2571_v55  ;;  %v819_v37 = vsel %vm755_vm11, %v2210_v5, 0.0  ;;  %v820_v59 = vsel %vm756_vm12, %v3302_v34, 0.0  ;;  %1438 = vpow2.f32 %v2495_v43  ;;  %v3304_v5 = vld [vmem:[#allocation29_spill] sm:$0xff] }
 0x137   : > { %v2661_v48 = vpop.eup %1422  ;;  %vm768_vm2 = vcmp.eq.s32.totalorder %v2280_v53, %v2622_v40  ;;  %v445_v33 = vmul.f32 1.442695, %v2547_v22  ;;  %v437_v35 = vmul.f32 1.442695, %v2349_v7  ;;  %v883_v41 = vadd.f32 %v882_v60, %v818_v51  ;;  %v3307_v22 = vld [vmem:[#allocation39_spill] sm:$0xff] }
 0x138   : > { %3303 = vst [vmem:[#allocation26_spill] sm:$0xff] %v2661_v48  ;;  %v2668_v63 = vpop.eup %1424  ;;  %1440 = vpow2.f32 %v2505_v54  ;;  %v382_v18 = vsub.f32 %v3305_v45, %v3304_v5  ;;  %vm758_vm3 = vcmp.eq.s32.totalorder %v2300_v19, %v2571_v55  ;;  %v886_v34 = vadd.f32 %v820_v59, %v819_v37  ;;  %v3306_v48 = vld [vmem:[#allocation31_spill] sm:$0xff]  ;;  %v2698_v55 = vpop.permute.xlu1 %709  ;;  %v3308_v59 = vld [vmem:[#allocation33_spill] sm:$0xff] }
 0x139   : > { %v2675_v43 = vpop.eup %1426  ;;  %884 = vadd.xlane.f32.xlu0 %v883_v41  ;;  %v821_v7 = vsel %vm757_vm1, %v3306_v48, 0.0  ;;  %vm761_vm4 = vcmp.eq.s32.totalorder %v2290_v25, %v2567_v58  ;;  %v823_v54 = vsel %vm759_vm14, %v3307_v22, 0.0  ;;  %v824_v45 = vsel %vm760_vm15, %v2272_v13, 0.0  ;;  %v3309_v48 = vld [vmem:[#allocation15_spill] sm:$0xff] }
 0x13a   : > { %v2691_v60 = vpop.eup %1428  ;;  %1442 = vpow2.f32 %v2512_v29  ;;  %vm763_vm5 = vcmp.eq.s32.totalorder %v2248_v3, %v2635_v36  ;;  %vm764_vm6 = vcmp.eq.s32.totalorder %v2280_v53, %v2635_v36  ;;  %v887_v51 = vadd.f32 %v886_v34, %v821_v7 }
 0x13b   : > { %v822_v37 = vsel %vm758_vm3, %v382_v18, 0.0  ;;  %v386_v41 = vsub.f32 %v3309_v48, %v3308_v59  ;;  %vm762_vm7 = vcmp.eq.s32.totalorder %v2300_v19, %v2567_v58  ;;  %v891_v13 = vadd.f32 %v824_v45, %v823_v54  ;;  %v2704_v5 = vpop.eup %1430  ;;  %v3311_v45 = vld [vmem:[#allocation32_spill] sm:$0xff]  ;;  %v3312_v59 = vld [vmem:[#allocation14_spill] sm:$0xff] }
 0x13c   : > { %3310 = vst [vmem:[#allocation27_spill] sm:$0xff] %v2704_v5  ;;  %1444 = vpow2.f32 %v2515_v62  ;;  %v453_v29 = vmul.f32 1.442695, %v2332_v26  ;;  %v888_v22 = vadd.f32 %v887_v51, %v822_v37  ;;  %v825_v34 = vsel %vm761_vm4, %v2277_v42, 0.0  ;;  %v2712_v7 = vpop.eup %1432  ;;  %v3313_v42 = vld [vmem:[#allocation34_spill] sm:$0xff]  ;;  %v3316_v5 = vld [vmem:[#allocation17_spill] sm:$0xff] }
 0x13d   : > { %1446 = vpow2.f32 %v2581_v27  ;;  %vm771_vm8 = vcmp.eq.s32.totalorder %v2248_v3, %v2698_v55  ;;  %v892_v54 = vadd.f32 %v891_v13, %v825_v34  ;;  %v390_v48 = vsub.f32 %v3312_v59, %v3311_v45  ;;  %v2719_v62 = vpop.eup %1434  ;;  %v3314_v34 = vld [vmem:[#allocation35_spill] sm:$0xff]  ;;  %v3315_v59 = vld [vmem:[#allocation38_spill] sm:$0xff] }
 0x13e   : > { %1448 = vpow2.f32 %v437_v35  ;;  %889 = vadd.xlane.f32.xlu1 %v888_v22  ;;  %v826_v26 = vsel %vm762_vm7, %v386_v41, 0.0  ;;  %vm765_vm9 = vcmp.eq.s32.totalorder %v2290_v25, %v2635_v36  ;;  %v827_v27 = vsel %vm763_vm5, %v3313_v42, 0.0  ;;  %v2727_v58 = vpop.eup %1436  ;;  %v2733_v22 = vpop.permute.xlu1 %717 }
 0x13f   : > { %v461_v51 = vmul.f32 1.442695, %v382_v18  ;;  %v469_v37 = vmul.f32 1.442695, %v386_v41  ;;  %v893_v13 = vadd.f32 %v892_v54, %v826_v26  ;;  %v828_v35 = vsel %vm764_vm6, %v3314_v34, 0.0  ;;  %v3318_v41 = vld [vmem:[#allocation37_spill] sm:$0xff] }
 0x140   : > { %1450 = vpow2.f32 %v445_v33  ;;  %vm766_vm10 = vcmp.eq.s32.totalorder %v2300_v19, %v2635_v36  ;;  %v896_v45 = vadd.f32 %v828_v35, %v827_v27  ;;  %v394_v42 = vsub.f32 %v3316_v5, %v3315_v59  ;;  %v2739_v57 = vpop.eup %1438  ;;  %v2761_v59 = vpop.permute.xlu0 %713 }
 0x141   : > { %3317 = vst [vmem:[#allocation28_spill] sm:$0xff] %v2739_v57  ;;  %894 = vadd.xlane.f32.xlu0 %v893_v13  ;;  %v477_v18 = vmul.f32 1.442695, %v390_v48  ;;  %v829_v54 = vsel %vm765_vm9, %v3318_v41, 0.0  ;;  %vm769_vm11 = vcmp.eq.s32.totalorder %v2290_v25, %v2622_v40  ;;  %v831_v33 = vsel %vm767_vm0, %v2311_v31, 0.0  ;;  %v3319_v41 = vld [vmem:[#allocation36_spill] sm:$0xff] }
 0x142   : > { %v2748_v26 = vpop.eup %1440  ;;  %1452 = vpow2.f32 %v453_v29  ;;  %vm772_vm12 = vcmp.eq.s32.totalorder %v2280_v53, %v2698_v55  ;;  %v897_v36 = vadd.f32 %v896_v45, %v829_v54  ;;  %v832_v5 = vsel %vm768_vm2, %v2318_v20, 0.0  ;;  %v3320_v54 = vld [vmem:[#allocation16_spill] sm:$0xff] }
 0x143   : > { %1454 = vpow2.f32 %v461_v51  ;;  %v830_v27 = vsel %vm766_vm10, %v390_v48, 0.0  ;;  %vm770_vm13 = vcmp.eq.s32.totalorder %v2300_v19, %v2622_v40  ;;  %v901_v13 = vadd.f32 %v832_v5, %v831_v33  ;;  %v2769_v51 = vpop.permute.xlu1 %725  ;;  %v3322_v33 = vld [vmem:[#allocation45_spill] sm:$0xff] }
 0x144   : > { %v2758_v34 = vpop.eup %1442  ;;  %1456 = vpow2.f32 %v469_v37  ;;  %v898_v31 = vadd.f32 %v897_v36, %v830_v27  ;;  %v485_v29 = vmul.f32 1.442695, %v394_v42  ;;  %v833_v35 = vsel %vm769_vm11, %v2322_v24, 0.0  ;;  %v3321_v37 = vld [vmem:[#allocation41_spill] sm:$0xff]  ;;  %v3323_v36 = vld [vmem:[#allocation46_spill] sm:$0xff] }
 0x145   : > { %1458 = vpow2.f32 %v477_v18  ;;  %v902_v45 = vadd.f32 %v901_v13, %v833_v35  ;;  %v398_v20 = vsub.f32 %v3320_v54, %v3319_v41  ;;  %vm773_vm14 = vcmp.eq.s32.totalorder %v2290_v25, %v2698_v55  ;;  %v3325_v41 = vld [vmem:[#allocation44_spill] sm:$0xff] }
 0x146   : > { %v2767_v48 = vpop.eup %1444  ;;  %899 = vadd.xlane.f32.xlu1 %v898_v31  ;;  %v834_v40 = vsel %vm770_vm13, %v394_v42, 0.0  ;;  %v835_v24 = vsel %vm771_vm8, %v3321_v37, 0.0  ;;  %v836_v18 = vsel %vm772_vm12, %v2297_v15, 0.0  ;;  %v559_v5 = vadd.f32 %v3323_v36, %v3322_v33  ;;  %v3326_v37 = vld [vmem:[#allocation48_spill] sm:$0xff]  ;;  %v3328_v36 = vld [vmem:[#allocation42_spill] sm:$0xff] }
 0x147   : > { %v2781_v27 = vpop.eup %1446  ;;  %v903_v13 = vadd.f32 %v902_v45, %v834_v40  ;;  %v493_v31 = vmul.f32 1.442695, %v398_v20  ;;  %vm774_vm15 = vcmp.eq.s32.totalorder %v2300_v19, %v2698_v55  ;;  %v906_v42 = vadd.f32 %v836_v18, %v835_v24  ;;  %v3327_v40 = vld [vmem:[#allocation40_spill] sm:$0xff] }
 0x148   : > { %3324 = vst [vmem:[#allocation30_spill] sm:$0xff] %v2781_v27  ;;  %v1449_v35 = vpop.eup %1448  ;;  %1460 = vpow2.f32 %v485_v29  ;;  %v837_v54 = vsel %vm773_vm14, %v3325_v41, 0.0  ;;  %v560_v57 = vadd.f32 %v3326_v37, %v559_v5  ;;  %v564_v15 = vadd.f32 %v2374_v38, %v2367_v46  ;;  %v2796_v5 = vpop.permute.xlu0 %721  ;;  %v3330_v37 = vld [vmem:[#allocation51_spill] sm:$0xff] }
 0x149   : > { %1462 = vpow2.f32 %v2613_v1  ;;  %v549_v33 = vmul.f32 1.442695, %v2594_v52  ;;  %904 = vadd.xlane.f32.xlu0 %v903_v13  ;;  %v907_v45 = vadd.f32 %v906_v42, %v837_v54  ;;  %v569_v27 = vadd.f32 %v3328_v36, %v3327_v40  ;;  %v3329_v1 = vld [vmem:[#allocation43_spill] sm:$0xff]  ;;  %v3333_v54 = vld [vmem:[#allocation69_spill] sm:$0xff] }
 0x14a   : > { %v1451_v55 = vpop.eup %1450  ;;  %1464 = vpow2.f32 %v493_v31  ;;  %v838_v24 = vsel %vm774_vm15, %v398_v20, 0.0  ;;  %v565_v29 = vadd.f32 %v2385_v6, %v564_v15  ;;  %v584_v18 = vadd.f32 %v2401_v23, %v2394_v16  ;;  %v2804_v20 = vpop.permute.xlu1 %733 }
 0x14b   : > { %v908_v38 = vadd.f32 %v907_v45, %v838_v24  ;;  %v561_v46 = vadd.f32 %v1449_v35, %v560_v57  ;;  %v570_v41 = vadd.f32 %v3329_v1, %v569_v27  ;;  %v574_v13 = vadd.f32 %v2351_v32, %v3330_v37  ;;  %v3332_v27 = vld [vmem:[#allocation53_spill] sm:$0xff]  ;;  %v3340_v37 = vld [vmem:[#allocation78_spill] sm:$0xff] }
 0x14c   : > { %v1453_v42 = vpop.eup %1452  ;;  %1466 = vpow2.f32 %v2630_v2  ;;  %vm779_vm0 = vcmp.eq.s32.totalorder %v2248_v3, %v2733_v22  ;;  %v579_v6 = vadd.f32 %v2422_v14, %v2415_v8  ;;  %v604_v23 = vadd.f32 %v2509_v12, %v2499_v4  ;;  %v3331_v4 = vld [vmem:[#allocation65_spill] sm:$0xff]  ;;  %v2837_v45 = vpop.permute.xlu0 %729 }
 0x14d   : > { %v1455_v16 = vpop.eup %1454  ;;  %1468 = vpow2.f32 %v2633_v61  ;;  %vm780_vm1 = vcmp.eq.s32.totalorder %v2280_v53, %v2733_v22  ;;  %vm787_vm2 = vcmp.eq.s32.totalorder %v2248_v3, %v2769_v51  ;;  %909 = vadd.xlane.f32.xlu1 %v908_v38  ;;  %562 = vadd.xlane.f32.xlu0 %v561_v46  ;;  %v594_v32 = vadd.f32 %v2451_v17, %v2440_v11 }
 0x14e   : > { %v1457_v57 = vpop.eup %1456  ;;  %vm775_vm3 = vcmp.eq.s32.totalorder %v2248_v3, %v2761_v59  ;;  %v566_v8 = vadd.f32 %v1451_v55, %v565_v29  ;;  %v571_v14 = vadd.f32 %v1453_v42, %v570_v41  ;;  %v585_v12 = vadd.f32 %v3331_v4, %v584_v18  ;;  %v3336_v29 = vld [vmem:[#allocation77_spill] sm:$0xff]  ;;  %v3341_v42 = vld [vmem:[#allocation27_spill] sm:$0xff] }
 0x14f   : > { %v589_v2 = vadd.f32 %v2478_v21, %v2469_v0  ;;  %v1459_v61 = vpop.eup %1458  ;;  %vm776_vm4 = vcmp.eq.s32.totalorder %v2280_v53, %v2761_v59  ;;  %v575_v31 = vadd.f32 %v3332_v27, %v574_v13  ;;  %v614_v11 = vadd.f32 %v2586_v39, %v2578_v10  ;;  %v3334_v39 = vld [vmem:[#allocation74_spill] sm:$0xff]  ;;  %v3345_v27 = vld [vmem:[#allocation59_spill] sm:$0xff] }
 0x150   : > { %v599_v17 = vadd.f32 %v2551_v47, %v2543_v44  ;;  %v624_v35 = vadd.f32 %v2675_v43, %v2668_v63  ;;  %vm788_vm5 = vcmp.eq.s32.totalorder %v2280_v53, %v2769_v51  ;;  %v580_v21 = vadd.f32 %v3333_v54, %v579_v6  ;;  %v3347_v54 = vld [vmem:[#allocation60_spill] sm:$0xff] }
 0x151   : > { %v605_v0 = vadd.f32 %v2520_v9, %v604_v23  ;;  %v609_v15 = vadd.f32 %v2626_v56, %v2617_v49  ;;  %1470 = vpow2.f32 %v549_v33  ;;  %vm795_vm6 = vcmp.eq.s32.totalorder %v2248_v3, %v2804_v20  ;;  %567 = vadd.xlane.f32.xlu1 %v566_v8  ;;  %572 = vadd.xlane.f32.xlu0 %v571_v14  ;;  %v2845_v9 = vpop.permute.xlu1 %741  ;;  %v3335_v49 = vld [vmem:[#allocation13_spill] sm:$0xff]  ;;  %v3342_v23 = vld [vmem:[#allocation26_spill] sm:$0xff] }
 0x152   : > { %v590_v44 = vadd.f32 %v2489_v28, %v589_v2  ;;  %v615_v47 = vadd.f32 %v2596_v30, %v614_v11  ;;  %v1461_v10 = vpop.eup %1460  ;;  %vm783_vm7 = vcmp.eq.s32.totalorder %v2248_v3, %v2796_v5  ;;  %v595_v63 = vadd.f32 %v3334_v39, %v594_v32  ;;  %v3343_v14 = vld [vmem:[#allocation58_spill] sm:$0xff] }
 0x153   : > { %v600_v56 = vadd.f32 %v3335_v49, %v599_v17  ;;  %v625_v43 = vadd.f32 %v2691_v60, %v624_v35  ;;  %v610_v33 = vadd.f32 %v2641_v50, %v609_v15  ;;  %v1463_v40 = vpop.eup %1462  ;;  %vm784_vm8 = vcmp.eq.s32.totalorder %v2280_v53, %v2796_v5  ;;  %v3337_v50 = vld [vmem:[#allocation47_spill] sm:$0xff]  ;;  %v3344_v2 = vld [vmem:[#allocation50_spill] sm:$0xff] }
 0x154   : > { %vm796_vm9 = vcmp.eq.s32.totalorder %v2280_v53, %v2804_v20  ;;  %v586_v28 = vadd.f32 %v1459_v61, %v585_v12  ;;  %v576_v30 = vadd.f32 %v1455_v16, %v575_v31  ;;  %v634_v36 = vadd.f32 %v2758_v34, %v2748_v26  ;;  %v1465_v55 = vpop.eup %1464  ;;  %v3338_v34 = vld [vmem:[#allocation24_spill] sm:$0xff] }
 0x155   : > { %v581_v24 = vadd.f32 %v1457_v57, %v580_v21  ;;  %v606_v18 = vadd.f32 %v3336_v29, %v605_v0  ;;  %v619_v60 = vadd.f32 %v2719_v62, %v2712_v7  ;;  %v843_v38 = vsel %vm779_vm0, %v3337_v50, 0.0  ;;  %v3339_v7 = vld [vmem:[#allocation49_spill] sm:$0xff]  ;;  %v2886_v57 = vpop.permute.xlu0 %737 }
 0x156   : > { %vm803_vm10 = vcmp.eq.s32.totalorder %v2248_v3, %v2845_v9  ;;  %vm804_vm11 = vcmp.eq.s32.totalorder %v2280_v53, %v2845_v9  ;;  %587 = vadd.xlane.f32.xlu1 %v586_v28  ;;  %577 = vadd.xlane.f32.xlu0 %v576_v30  ;;  %v591_v26 = vadd.f32 %v1461_v10, %v590_v44  ;;  %v844_v62 = vsel %vm780_vm1, %v3339_v7, 0.0  ;;  %v1467_v1 = vpop.eup %1466  ;;  %v3348_v0 = vld [vmem:[#allocation61_spill] sm:$0xff]  ;;  %v3349_v44 = vld [vmem:[#allocation55_spill] sm:$0xff] }
 0x157   : > { %v616_v46 = vadd.f32 %v3338_v34, %v615_v47  ;;  %vm781_vm12 = vcmp.eq.s32.totalorder %v2290_v25, %v2733_v22  ;;  %v596_v41 = vadd.f32 %v1465_v55, %v595_v63  ;;  %v601_v13 = vadd.f32 %v3340_v37, %v600_v56  ;;  %v2882_v32 = vpop.eup %1468  ;;  %v3351_v56 = vld [vmem:[#allocation57_spill] sm:$0xff]  ;;  %v3357_v7 = vld [vmem:[#allocation63_spill] sm:$0xff] }
 0x158   : > { %v2877_v6 = vadd.f32 %v3341_v42, %v625_v43  ;;  %v2880_v16 = vadd.f32 %v3342_v23, %v610_v33  ;;  %vm791_vm13 = vcmp.eq.s32.totalorder %v2248_v3, %v2837_v45  ;;  %v635_v8 = vadd.f32 %v2767_v48, %v634_v36  ;;  %v3352_v33 = vld [vmem:[#allocation67_spill] sm:$0xff]  ;;  %v3359_v37 = vld [vmem:[#allocation21_spill] sm:$0xff]  ;;  %v3360_v23 = vld [vmem:[#allocation30_spill] sm:$0xff] }
 0x159   : > { %vm789_vm14 = vcmp.eq.s32.totalorder %v2290_v25, %v2769_v51  ;;  %vm790_vm15 = vcmp.eq.s32.totalorder %v2300_v19, %v2769_v51  ;;  %v851_v4 = vsel %vm787_vm2, %v3343_v14, 0.0  ;;  %vm792_vm0 = vcmp.eq.s32.totalorder %v2280_v53, %v2837_v45  ;;  %v3350_v51 = vld [vmem:[#allocation56_spill] sm:$0xff] }
 0x15a   : > { %v2900_v12 = vadd.f32 %v2727_v58, %v619_v60  ;;  %v2906_v48 = vsel %vm781_vm12, %v3344_v2, 0.0  ;;  %v2908_v61 = vadd.f32 %v844_v62, %v843_v38  ;;  %v852_v31 = vsel %vm788_vm5, %v3345_v27, 0.0  ;;  %597 = vadd.xlane.f32.xlu1 %v596_v41  ;;  %582 = vadd.xlane.f32.xlu0 %v581_v24  ;;  %v3346_v58 = vld [vmem:[#allocation54_spill] sm:$0xff]  ;;  %v3356_v38 = vld [vmem:[#allocation71_spill] sm:$0xff]  ;;  %v3361_v2 = vld [vmem:[#allocation64_spill] sm:$0xff] }
 0x15b   : > { %v2914_v11 = vadd.f32 %v1467_v1, %v1463_v40  ;;  %v926_v17 = vadd.f32 %v852_v31, %v851_v4  ;;  %vm777_vm1 = vcmp.eq.s32.totalorder %v2290_v25, %v2761_v59  ;;  %v839_v35 = vsel %vm775_vm3, %v3346_v58, 0.0  ;;  %v2940_v10 = vpop.eup %1470  ;;  %v3353_v40 = vld [vmem:[#allocation68_spill] sm:$0xff]  ;;  %v3354_v24 = vld [vmem:[#allocation62_spill] sm:$0xff]  ;;  %v3362_v58 = vld [vmem:[#allocation75_spill] sm:$0xff] }
 0x15c   : > { %vm799_vm2 = vcmp.eq.s32.totalorder %v2248_v3, %v2886_v57  ;;  %vm800_vm12 = vcmp.eq.s32.totalorder %v2280_v53, %v2886_v57  ;;  %v853_v21 = vsel %vm789_vm14, %v3347_v54, 0.0  ;;  %v854_v15 = vsel %vm790_vm15, %v3348_v0, 0.0  ;;  %v3355_v60 = vld [vmem:[#allocation70_spill] sm:$0xff]  ;;  %v3358_v1 = vld [vmem:[#allocation20_spill] sm:$0xff] }
 0x15d   : > { %vm778_vm5 = vcmp.eq.s32.totalorder %v2300_v19, %v2761_v59  ;;  %v840_v47 = vsel %vm776_vm4, %v3349_v44, 0.0  ;;  %v927_v39 = vadd.f32 %v926_v17, %v853_v21  ;;  %vm797_vm3 = vcmp.eq.s32.totalorder %v2290_v25, %v2804_v20  ;;  %v3363_v54 = vld [vmem:[#allocation18_spill] sm:$0xff] }
 0x15e   : > { %v911_v63 = vadd.f32 %v840_v47, %v839_v35  ;;  %vm798_vm14 = vcmp.eq.s32.totalorder %v2300_v19, %v2804_v20  ;;  %v841_v49 = vsel %vm777_vm1, %v3350_v51, 0.0  ;;  %v842_v43 = vsel %vm778_vm5, %v3351_v56, 0.0  ;;  %607 = vadd.xlane.f32.xlu1 %v606_v18  ;;  %592 = vadd.xlane.f32.xlu0 %v591_v26  ;;  %v3364_v21 = vld [vmem:[#allocation66_spill] sm:$0xff] }
 0x15f   : > { %v859_v59 = vsel %vm795_vm6, %v3352_v33, 0.0  ;;  %v860_v28 = vsel %vm796_vm9, %v3353_v40, 0.0  ;;  %v928_v30 = vadd.f32 %v927_v39, %v854_v15  ;;  %v847_v29 = vsel %vm783_vm7, %v3354_v24, 0.0  ;;  %v3366_v15 = vld [vmem:[#allocation19_spill] sm:$0xff]  ;;  %v3370_v33 = vld [vmem:[#allocation28_spill] sm:$0xff] }
 0x160   : > { %v912_v36 = vadd.f32 %v911_v63, %v841_v49  ;;  %v936_v55 = vadd.f32 %v860_v28, %v859_v59  ;;  %v861_v50 = vsel %vm797_vm3, %v3355_v60, 0.0  ;;  %v862_v34 = vsel %vm798_vm14, %v3356_v38, 0.0  ;;  %v3367_v63 = vld [vmem:[#allocation72_spill] sm:$0xff]  ;;  %v3368_v49 = vld [vmem:[#allocation22_spill] sm:$0xff]  ;;  %v3371_v28 = vld [vmem:[#allocation73_spill] sm:$0xff] }
 0x161   : > { %vm785_vm4 = vcmp.eq.s32.totalorder %v2290_v25, %v2796_v5  ;;  %v848_v20 = vsel %vm784_vm8, %v3357_v7, 0.0  ;;  %vm782_vm6 = vcmp.eq.s32.totalorder %v2300_v19, %v2733_v22  ;;  %vm786_vm7 = vcmp.eq.s32.totalorder %v2300_v19, %v2796_v5  ;;  %v3373_v60 = vld [vmem:[#allocation52_spill] sm:$0xff]  ;;  %v1100_v22 = vld [vmem:[#allocation3] sm:$0x1] }
 0x162   : > { %v913_v18 = vadd.f32 %v912_v36, %v842_v43  ;;  %v937_v26 = vadd.f32 %v936_v55, %v861_v50  ;;  %vm805_vm9 = vcmp.eq.s32.totalorder %v2290_v25, %v2845_v9  ;;  %v921_v62 = vadd.f32 %v848_v20, %v847_v29  ;;  %617 = vadd.xlane.f32.xlu1 %v616_v46  ;;  %v3369_v43 = vld [vmem:[#allocation23_spill] sm:$0xff] }
 0x163   : > { %vm806_vm15 = vcmp.eq.s32.totalorder %v2300_v19, %v2845_v9  ;;  %v867_v41 = vsel %vm803_vm10, %v3358_v1, 0.0  ;;  %v868_v42 = vsel %vm804_vm11, %v3359_v37, 0.0  ;;  %602 = vadd.xlane.f32.xlu0 %v601_v13  ;;  %v636_v14 = vadd.f32 %v3360_v23, %v635_v8  ;;  %v3365_v13 = vld [vmem:[#allocation76_spill] sm:$0xff]  ;;  %v3372_v55 = vld [vmem:[#allocation79_spill] sm:$0xff] }
 0x164   : > { %v938_v4 = vadd.f32 %v937_v26, %v862_v34  ;;  %v849_v27 = vsel %vm785_vm4, %v3361_v2, 0.0  ;;  %v946_v31 = vadd.f32 %v868_v42, %v867_v41  ;;  %v869_v35 = vsel %vm805_vm9, %v3362_v58, 0.0 }
 0x165   : > { %v922_v17 = vadd.f32 %v921_v62, %v849_v27  ;;  %vm793_vm8 = vcmp.eq.s32.totalorder %v2290_v25, %v2837_v45  ;;  %v855_v9 = vsel %vm791_vm13, %v3363_v54, 0.0  ;;  %v850_v46 = vsel %vm786_vm7, %v3364_v21, 0.0 }
 0x166   : > { %v870_v8 = vsel %vm806_vm15, %v3365_v13, 0.0  ;;  %v947_v0 = vadd.f32 %v946_v31, %v869_v35  ;;  %v856_v44 = vsel %vm792_vm0, %v3366_v15, 0.0  ;;  %vm794_vm10 = vcmp.eq.s32.totalorder %v2300_v19, %v2837_v45  ;;  %627 = vadd.xlane.f32.xlu1 %v2877_v6  ;;  %v3374_v13 = vld [vmem:[#allocation25_spill] sm:$0xff] }
 0x167   : > { %v923_v47 = vadd.f32 %v922_v17, %v850_v46  ;;  %v931_v39 = vadd.f32 %v856_v44, %v855_v9  ;;  %vm801_vm11 = vcmp.eq.s32.totalorder %v2290_v25, %v2886_v57  ;;  %612 = vadd.xlane.f32.xlu0 %v2880_v16  ;;  %v857_v51 = vsel %vm793_vm8, %v3367_v63, 0.0 }
 0x168   : > { %v948_v5 = vadd.f32 %v947_v0, %v870_v8  ;;  %v863_v56 = vsel %vm799_vm2, %v3368_v49, 0.0  ;;  %v864_v45 = vsel %vm800_vm12, %v3369_v43, 0.0  ;;  %v621_v25 = vadd.f32 %v3370_v33, %v2900_v12 }
 0x169   : > { %v932_v59 = vadd.f32 %v931_v39, %v857_v51  ;;  %vm802_vm13 = vcmp.eq.s32.totalorder %v2300_v19, %v2886_v57  ;;  %v941_v6 = vadd.f32 %v864_v45, %v863_v56  ;;  %v917_v16 = vadd.f32 %v2908_v61, %v2906_v48 }
 0x16a   : > { %v630_v40 = vadd.f32 %v2882_v32, %v2914_v11  ;;  %v858_v36 = vsel %vm794_vm10, %v3371_v28, 0.0  ;;  %v865_v24 = vsel %vm801_vm11, %v3372_v55, 0.0  ;;  %637 = vadd.xlane.f32.xlu1 %v636_v14  ;;  %v866_v12 = vsel %vm802_vm13, %v2594_v52, 0.0  ;;  %v3034_v11 = vld [vmem:[%s2172_s4] sm:$0x1] }
 0x16b   : > { %v933_v53 = vadd.f32 %v932_v59, %v858_v36  ;;  %v942_v29 = vadd.f32 %v941_v6, %v865_v24  ;;  %622 = vadd.xlane.f32.xlu0 %v621_v25  ;;  %v846_v57 = vsel %vm782_vm6, %v3373_v60, 0.0  ;;  %vm951_vm0 = vcmp.ne.s32.totalorder %v3034_v11, 0 }
 0x16c   : > { %v918_v61 = vadd.f32 %v917_v16, %v846_v57  ;;  %v631_v32 = vadd.f32 %v2940_v10, %v630_v40  ;;  %v1669_v52 = vmov 0.0   ;;  %v988_v31 = vadd.s32 4294967288, %v2248_v3 }
 0x16d   : > { %v943_v48 = vadd.f32 %v942_v29, %v866_v12  ;;  %v1235_v19 = vsel %vm951_vm0, 1.0, %v1669_v52  ;;  %v995_v9 = vadd.s32 4294967280, %v2248_v3  ;;  %v1002_v15 = vadd.s32 4294967272, %v2248_v3 }
 0x16e   : > { %919 = vadd.xlane.f32.xlu1 %v918_v61  ;;  %v1101_v50 = vadd.f32 %v1235_v19, %v1100_v22  ;;  %v991_v8 = vsub.s32 %v988_v31, %v3374_v13  ;;  %v986_v63 = vsub.s32 %v2248_v3, %v3374_v13  ;;  %vm993_vm1 = vcmask 130112  }
 0x16f   : > { %632 = vadd.xlane.f32.xlu0 %v631_v32  ;;  %v998_v56 = vsub.s32 %v995_v9, %v3374_v13  ;;  %v1005_v25 = vsub.s32 %v1002_v15, %v3374_v13  ;;  %v1016_v40 = vadd.s32 4294967256, %v2248_v3  ;;  %v1023_v55 = vadd.s32 4294967248, %v2248_v3 }
 0x170   : > { %1102 = vst [vmem:[#allocation3] sm:$0x1] %v1101_v50  ;;  %vm1000_vm2 = vcmask 195712   ;;  %vm1007_vm12 = vcmask 261312   ;;  %v1030_v32 = vadd.s32 4294967240, %v2248_v3  ;;  %vm1014_vm5 = vcmask 326912  }
 0x171   : > { %v1019_v22 = vsub.s32 %v1016_v40, %v3374_v13  ;;  %vm1021_vm3 = vcmask 392512   ;;  %vm1028_vm14 = vcmask 458112   ;;  %vm1035_vm4 = vcmask 523712  }
 0x172   : > { %929 = vadd.xlane.f32.xlu1 %v928_v30  ;;  %vm1042_vm6 = vcmask 589312   ;;  %v1072_v40 = vadd.s32 4294967192, %v2248_v3  ;;  %vm1049_vm7 = vcmask 654912   ;;  %vm1056_vm9 = vcmask 720512  }
 0x173   : > { %914 = vadd.xlane.f32.xlu0 %v913_v18  ;;  %vm1063_vm15 = vcmask 786112   ;;  %vm1070_vm8 = vcmask 851712   ;;  %vm1077_vm10 = vcmask 917312   ;;  %vm1084_vm11 = vcmask 982912  }
 0x174   : > { %vm1091_vm13 = vcmask 1048512  }
 0x176   : > { %939 = vadd.xlane.f32.xlu1 %v938_v4 }
 0x177   : > { %924 = vadd.xlane.f32.xlu0 %v923_v47 }
 0x17a   : > { %949 = vadd.xlane.f32.xlu1 %v948_v5  ;;  %v1009_v5 = vadd.s32 4294967264, %v2248_v3 }
 0x17b   : > { %934 = vadd.xlane.f32.xlu0 %v933_v53 }
 0x17c   : > { %v1012_v28 = vsub.s32 %v1009_v5, %v3374_v13  ;;  %v1058_v5 = vadd.s32 4294967208, %v2248_v3 }
 0x17f   : > { %944 = vadd.xlane.f32.xlu0 %v943_v48 }
 0x1be   : > { %v880_v10 = vpop.xlane.xlu0 %879 }
 0x1c1   : > { %v875_v38 = vpop.xlane.xlu1 %874 }
 0x1c6   : > { %v3039_v30 = vpop.xlane.xlu0 %884 }
 0x1cb   : > { %v3041_v34 = vpop.xlane.xlu1 %889 }
 0x1ce   : > { %v3043_v7 = vpop.xlane.xlu0 %894 }
 0x1d3   : > { %v3045_v20 = vpop.xlane.xlu1 %899 }
 0x1d6   : > { %v3047_v18 = vpop.xlane.xlu0 %904 }
 0x1da   : > { %v3049_v26 = vpop.xlane.xlu1 %909  ;;  %v563_v62 = vpop.xlane.xlu0 %562 }
 0x1db   : > { %1472 = vlog2.f32 %v563_v62 }
 0x1de   : > { %v568_v1 = vpop.xlane.xlu1 %567  ;;  %v573_v41 = vpop.xlane.xlu0 %572 }
 0x1df   : > { %1474 = vlog2.f32 %v568_v1  ;;  %v1037_v1 = vadd.s32 4294967232, %v2248_v3 }
 0x1e0   : > { %1476 = vlog2.f32 %v573_v41 }
 0x1e3   : > { %v588_v37 = vpop.xlane.xlu1 %587  ;;  %v578_v42 = vpop.xlane.xlu0 %577 }
 0x1e4   : > { %1478 = vlog2.f32 %v578_v42  ;;  %v1033_v42 = vsub.s32 %v1030_v32, %v3374_v13 }
 0x1e5   : > { %1480 = vlog2.f32 %v588_v37  ;;  %v1473_v4 = vpop.eup %1472 }
 0x1e6   : > { %v640_v54 = vmul.f32 0.6931472, %v1473_v4 }
 0x1e7   : > { %v598_v23 = vpop.xlane.xlu1 %597  ;;  %v583_v14 = vpop.xlane.xlu0 %582 }
 0x1e8   : > { %1482 = vlog2.f32 %v583_v14  ;;  %v952_v51 = vsub.f32 %v640_v54, %v875_v38 }
 0x1e9   : > { %v1475_v2 = vpop.eup %1474  ;;  %1484 = vlog2.f32 %v598_v23  ;;  %v1044_v23 = vadd.s32 4294967224, %v2248_v3 }
 0x1ea   : > { %v1477_v27 = vpop.eup %1476  ;;  %v642_v17 = vmul.f32 0.6931472, %v1475_v2  ;;  %v987_v24 = vrot.slane %v952_v51, %v986_v63 }
 0x1eb   : > { %v608_v58 = vpop.xlane.xlu1 %607  ;;  %v593_v35 = vpop.xlane.xlu0 %592  ;;  %v644_v21 = vmul.f32 0.6931472, %v1477_v27  ;;  %v1047_v15 = vsub.s32 %v1044_v23, %v3374_v13 }
 0x1ec   : > { %1486 = vlog2.f32 %v593_v35  ;;  %v953_v0 = vsub.f32 %v642_v17, %v880_v10  ;;  %v1026_v10 = vsub.s32 %v1023_v55, %v3374_v13  ;;  %v1051_v35 = vadd.s32 4294967216, %v2248_v3 }
 0x1ed   : > { %v954_v43 = vsub.f32 %v644_v21, %v3039_v30  ;;  %v1061_v55 = vsub.s32 %v1058_v5, %v3374_v13 }
 0x1ee   : > { %v1479_v46 = vpop.eup %1478  ;;  %v992_v33 = vrot.slane %v953_v0, %v991_v8 }
 0x1ef   : > { %v618_v44 = vpop.xlane.xlu1 %617  ;;  %v646_v39 = vmul.f32 0.6931472, %v1479_v46  ;;  %v1481_v49 = vpop.eup %1480  ;;  %v999_v12 = vrot.slane %v954_v43, %v998_v56  ;;  %v1065_v56 = vadd.s32 4294967200, %v2248_v3 }
 0x1f0   : > { %v603_v47 = vpop.xlane.xlu0 %602  ;;  %v650_v53 = vmul.f32 0.6931472, %v1481_v49  ;;  %v994_v48 = vsel %vm993_vm1, %v992_v33, %v987_v24  ;;  %v1054_v49 = vsub.s32 %v1051_v35, %v3374_v13  ;;  %vm1108_vm1 = vcmask (!%p1236_p0), 1040384  }
 0x1f1   : > { %1488 = vlog2.f32 %v603_v47  ;;  %v955_v59 = vsub.f32 %v646_v39, %v3041_v34 }
 0x1f2   : > { %1490 = vlog2.f32 %v608_v58  ;;  %v1483_v45 = vpop.eup %1482  ;;  %v957_v30 = vsub.f32 %v650_v53, %v3045_v20  ;;  %v1040_v58 = vsub.s32 %v1037_v1, %v3374_v13 }
 0x1f3   : > { %v628_v6 = vpop.xlane.xlu1 %627  ;;  %v648_v36 = vmul.f32 0.6931472, %v1483_v45  ;;  %v1485_v29 = vpop.eup %1484  ;;  %v1006_v61 = vrot.slane %v955_v59, %v1005_v25 }
 0x1f4   : > { %v613_v16 = vpop.xlane.xlu0 %612  ;;  %v654_v34 = vmul.f32 0.6931472, %v1485_v29  ;;  %v1020_v31 = vrot.slane %v957_v30, %v1019_v22  ;;  %v1075_v22 = vsub.s32 %v1072_v40, %v3374_v13 }
 0x1f5   : > { %1492 = vlog2.f32 %v613_v16  ;;  %v956_v60 = vsub.f32 %v648_v36, %v3043_v7  ;;  %v1001_v7 = vsel %vm1000_vm2, %v999_v12, %v994_v48  ;;  %vm1121_vm2 = vcmask (!%p1236_p0), 0  }
 0x1f6   : > { %1494 = vlog2.f32 %v618_v44  ;;  %v1487_v57 = vpop.eup %1486  ;;  %v1008_v37 = vsel %vm1007_vm12, %v1006_v61, %v1001_v7 }
 0x1f7   : > { %v638_v52 = vpop.xlane.xlu1 %637  ;;  %v1013_v50 = vrot.slane %v956_v60, %v1012_v28  ;;  %v652_v38 = vmul.f32 0.6931472, %v1487_v57  ;;  %v1068_v60 = vsub.s32 %v1065_v56, %v3374_v13  ;;  %v1079_v57 = vadd.s32 4294967184, %v2248_v3 }
 0x1f8   : > { %v623_v19 = vpop.xlane.xlu0 %622 }
 0x1f9   : > { %1496 = vlog2.f32 %v623_v19  ;;  %v958_v62 = vsub.f32 %v652_v38, %v3047_v18  ;;  %v1015_v2 = vsel %vm1014_vm5, %v1013_v50, %v1008_v37  ;;  %v959_v18 = vsub.f32 %v654_v34, %v3049_v26 }
 0x1fa   : > { %1498 = vlog2.f32 %v628_v6  ;;  %v1022_v46 = vsel %vm1021_vm3, %v1020_v31, %v1015_v2 }
 0x1fb   : > { %v1489_v41 = vpop.eup %1488  ;;  %v920_v14 = vpop.xlane.xlu1 %919  ;;  %v1027_v27 = vrot.slane %v958_v62, %v1026_v10  ;;  %1500 = vlog2.f32 %v638_v52  ;;  %v1034_v39 = vrot.slane %v959_v18, %v1033_v42  ;;  %v1086_v52 = vadd.s32 4294967176, %v2248_v3  ;;  %v1097_v18 = vld [vmem:[#allocation2] sm:$0x1] }
 0x1fc   : > { %v633_v4 = vpop.xlane.xlu0 %632  ;;  %v1491_v20 = vpop.eup %1490  ;;  %v656_v17 = vmul.f32 0.6931472, %v1489_v41  ;;  %v1082_v41 = vsub.s32 %v1079_v57, %v3374_v13 }
 0x1fd   : > { %1502 = vlog2.f32 %v633_v4  ;;  %v658_v9 = vmul.f32 0.6931472, %v1491_v20  ;;  %v1029_v44 = vsel %vm1028_vm14, %v1027_v27, %v1022_v46  ;;  %v1089_v37 = vsub.s32 %v1086_v52, %v3374_v13  ;;  %v1112_v13 = vld [vmem:[#allocation3] sm:$0x1] (!%p1236_p0) }
 0x1fe   : > { %v1036_v33 = vsel %vm1035_vm4, %v1034_v39, %v1029_v44 }
 0x1ff   : > { %v1493_v54 = vpop.eup %1492  ;;  %v930_v21 = vpop.xlane.xlu1 %929  ;;  %v961_v26 = vsub.f32 %v658_v9, %v920_v14 }
 0x200   : > { %v915_v8 = vpop.xlane.xlu0 %914  ;;  %v1495_v0 = vpop.eup %1494  ;;  %v660_v51 = vmul.f32 0.6931472, %v1493_v54 }
 0x201   : > { %v960_v47 = vsub.f32 %v656_v17, %v915_v8  ;;  %v662_v45 = vmul.f32 0.6931472, %v1495_v0  ;;  %v1048_v36 = vrot.slane %v961_v26, %v1047_v15 }
 0x203   : > { %v1041_v63 = vrot.slane %v960_v47, %v1040_v58  ;;  %v1497_v43 = vpop.eup %1496  ;;  %v940_v25 = vpop.xlane.xlu1 %939  ;;  %v963_v24 = vsub.f32 %v662_v45, %v930_v21  ;;  %v1113_v21 = vsel (!%p1236_p0), %vm1108_vm1, %v1112_v13, 0.0 }
 0x204   : > { %v925_v59 = vpop.xlane.xlu0 %924  ;;  %v1499_v6 = vpop.eup %1498  ;;  %v664_v12 = vmul.f32 0.6931472, %v1497_v43  ;;  %1114 = vadd.xlane.f32.xlu0 (!%p1236_p0), %v1113_v21 }
 0x205   : > { %v1043_v16 = vsel %vm1042_vm6, %v1041_v63, %v1036_v33  ;;  %v962_v28 = vsub.f32 %v660_v51, %v925_v59  ;;  %v1501_v53 = vpop.eup %1500  ;;  %v666_v61 = vmul.f32 0.6931472, %v1499_v6  ;;  %v1062_v30 = vrot.slane %v963_v24, %v1061_v55 }
 0x206   : > { %v1050_v32 = vsel %vm1049_vm7, %v1048_v36, %v1043_v16  ;;  %v670_v7 = vmul.f32 0.6931472, %v1501_v53 }
 0x207   : > { %v1055_v29 = vrot.slane %v962_v28, %v1054_v49  ;;  %v1503_v48 = vpop.eup %1502  ;;  %v950_v10 = vpop.xlane.xlu1 %949  ;;  %v965_v34 = vsub.f32 %v666_v61, %v940_v25 }
 0x208   : > { %v935_v19 = vpop.xlane.xlu0 %934  ;;  %v668_v1 = vmul.f32 0.6931472, %v1503_v48  ;;  %v967_v42 = vsub.f32 %v670_v7, %v950_v10 }
 0x209   : > { %v1057_v50 = vsel %vm1056_vm9, %v1055_v29, %v1050_v32  ;;  %v964_v38 = vsub.f32 %v664_v12, %v935_v19  ;;  %v1076_v20 = vrot.slane %v965_v34, %v1075_v22 }
 0x20a   : > { %v1064_v23 = vsel %vm1063_vm15, %v1062_v30, %v1057_v50  ;;  %v1090_v27 = vrot.slane %v967_v42, %v1089_v37 }
 0x20b   : > { %v1069_v62 = vrot.slane %v964_v38, %v1068_v60 }
 0x20c   : > { %v945_v3 = vpop.xlane.xlu0 %944 }
 0x20d   : > { %v1071_v14 = vsel %vm1070_vm8, %v1069_v62, %v1064_v23  ;;  %v966_v4 = vsub.f32 %v668_v1, %v945_v3 }
 0x20e   : > { %v1078_v31 = vsel %vm1077_vm10, %v1076_v20, %v1071_v14 }
 0x20f   : > { %v1083_v2 = vrot.slane %v966_v4, %v1082_v41 }
 0x210   : > { %1106 = sbr.rel (%p1236_p0) target bundleno = 689 (0x2b1), region = 44 }
 0x211   : > { %v1085_v17 = vsel %vm1084_vm11, %v1083_v2, %v1078_v31 }
 0x212   : > { %v1092_v58 = vsel %vm1091_vm13, %v1090_v27, %v1085_v17 }
 0x213   : > { %v1094_v35 = vsel %vm951_vm0, %v1092_v58, 0.0 }
 0x214   : > { %v1098_v54 = vadd.f32 %v1097_v18, %v1094_v35 }
 0x216   : > { %1099 = vst [vmem:[#allocation2] sm:$0x1] %v1098_v54 }
 0x21d   : > { %v1107_v9 = vld [vmem:[#allocation2] sm:$0x1] }
 0x21e   : > { %v1109_v46 = vsel %vm1108_vm1, %v1107_v9, 0.0 }
 0x21f   : > { %1110 = vadd.xlane.f32.xlu0 %v1109_v46 }
 0x291   : > { %v1115_v8 = vpop.xlane.xlu0 %1114 }
 0x292   : > { %v1117_v0 = vmax.f32 %v1115_v8, 1.0  ;;  %vm1116_vm0 = vcmp.gt.f32.partialorder %v1115_v8, 0.0 }
 0x294   : > { %1505 = vrcp.f32 %v1117_v0 }
 0x29e   : > { %v1506_v44 = vpop.eup %1505 }
 0x2ac   : > { %v1111_v15 = vpop.xlane.xlu0 %1110 }
 0x2ad   : > { %v1119_v11 = vmul.f32 %v1506_v44, %v1111_v15 }
 0x2af   : > { %v1120_v47 = vsel %vm1116_vm0, %v1119_v11, 0.0 }
 0x2b0   : > { %1122 = vst.msk [vmem:[%s214_s29] sm:$0x1] %vm1121_vm2, %v1120_v47 }
 0x2b1 PF: > { %s18_s19 = sadd.s32 1, %s1662_s19   ;;  %s3375_s27 = sld [smem:[#allocation10_spill]] }
 0x2b2   : > { %p15_p12 = scmp.ge.s32.totalorder %s18_s19, 6   ;;  %s3376_s23 = sld [smem:[#allocation11_spill]] }
 0x2b3   : > { %s3377_s9 = smov %s1626_s10  ;;  %s3378_s10 = smov %s1630_s11 }
 0x2b4   : > { %s3379_s11 = smov %s1837_s8  ;;  %s3380_s12 = smov %s1638_s13 }
 0x2b5   : > { %s3381_s13 = smov %s1642_s14  ;;  %s3382_s14 = smov %s1771_s5 }
 0x2b6   : > { %s3383_s15 = smov %s1654_s17  ;;  %s3384_s16 = smov %s1658_s18 }
 0x2b7   : > { %s3385_s17 = smov %s3375_s27  ;;  %17 = sbr.rel (!%p15_p12) target bundleno = 9 (0x9), region = 90 }
 0x2b8   : > { %s3386_s18 = smov %s3376_s23 }
 0x2be   :  { %1140 = vsyncpa [#allocation5], 1 }
 0x2bf   :  { %1142 = vsyncpa [#allocation5 + $0x1], 1 }
 0x2c0   :  { %1143 = vsyncpa [#allocation7], 1 }
 0x2c1   :  { %1145 = vsyncpa [#allocation7 + $0x1], 1 }

</bundles_post_ra>
